<compile_context>
chip_gen: v6e
topology: v6e:2x2x1
jax: 0.10.0
libtpu: 0.0.40
codegen_flags: <defaults>
</compile_context>

<pallas_src>
import functools
import math

import jax
import jax.numpy as jnp
from jax.experimental import pallas as pl
from jax.experimental.pallas import tpu as pltpu


def _cdiv(a, b):
    return -(-a // b)


def _legendre_kernel(x_ref, o_ref, *, n):
    # x_ref: (tile_r, L)   o_ref: (tile_r, n, L)
    x = x_ref[...].astype(jnp.float32)
    p_prev = jnp.ones_like(x)                          # P_0(x) = 1
    o_ref[:, 0, :] = p_prev.astype(o_ref.dtype)
    if n > 1:
        p = x                                          # P_1(x) = x
        o_ref[:, 1, :] = p.astype(o_ref.dtype)
        for i in range(2, n):                          # static unroll, n small
            p_next = ((2.0 * i - 1.0) * x * p - (i - 1.0) * p_prev) * (1.0 / i)
            o_ref[:, i, :] = p_next.astype(o_ref.dtype)
            p_prev, p = p, p_next


def legendre_basis(x, n, *, block_rows=None, vmem_budget_bytes=20 * 1024 * 1024):
    """Pallas TPU implementation of LegendreBasis(n).forward(x)."""
    assert n > 0
    assert x.ndim >= 1
    orig_shape = x.shape
    L = orig_shape[-1]
    R = math.prod(orig_shape[:-1]) if x.ndim > 1 else 1
    x2 = x.reshape(R, L)

    # VMEM footprint per row (lane-padded to 128, basis dim padded to 8),
    # doubled for the input+output double buffers.
    itemsize = jnp.dtype(x.dtype).itemsize
    lanes = _cdiv(L, 128) * 128
    in_row = lanes * itemsize
    out_row = (_cdiv(n, 8) * 8) * lanes * itemsize
    per_row = 2 * (in_row + out_row)

    if block_rows is None:
        block_rows = min(4096, max(8, vmem_budget_bytes // per_row))
        block_rows = max(8, (block_rows // 8) * 8)
    # Tiny inputs: one full block (avoids padding waste); otherwise tile rows.
    tile_r = R if R <= block_rows else block_rows
    grid = (_cdiv(R, tile_r),)

    out = pl.pallas_call(
        functools.partial(_legendre_kernel, n=n),
        out_shape=jax.ShapeDtypeStruct((R, n, L), x.dtype),
        grid_spec=pltpu.PrefetchScalarGridSpec(
            num_scalar_prefetch=0,
            grid=grid,
            in_specs=[pl.BlockSpec((tile_r, L), lambda b: (b, 0))],
            out_specs=pl.BlockSpec((tile_r, n, L), lambda b: (b, 0, 0)),
        ),
        compiler_params=pltpu.CompilerParams(
            dimension_semantics=("parallel",),   # megacore sharding on v7x
            vmem_limit_bytes=48 * 1024 * 1024,   # above v5e's 16 MiB default
        ),
    )(x2)

    # Contiguous reshape (free): (R, n, L) -> (..., n*L), i.e. cat along dim=-1.
    return out.reshape(*orig_shape[:-1], n * L)


# ----------------------- pure-JAX reference (port of the PyTorch module) ----
def _legendre_coef_table(n):
    basis = [None] * n
    basis[0] = [1.0]
    if n > 1:
        basis[1] = [0.0, 1.0]
    for i in range(2, n):
        c0, c1 = basis[i - 2], basis[i - 1]
        coefs = [0.0] * (i + 1)
        coefs[0] = -(i - 1) / i * c0[0]
        for j in range(1, i - 1):
            coefs[j] = (2 * i - 1) / i * c1[j - 1] - (i - 1) / i * c0[j]
        coefs[i - 1] = (2 * i - 1) / i * c1[i - 2]
        coefs[i] = (2 * i - 1) / i * c1[i - 1]
        basis[i] = coefs
    return basis


def legendre_reference(x, n):
    """Direct port of LegendreBasis.forward (Poly evaluation + cat along -1)."""
    outs = []
    for coefs in _legendre_coef_table(n):
        y = jnp.ones_like(x)
        u = jnp.zeros_like(x)
        for c in coefs:
            u = u + 1.0 * c * y
            y = y * x
        outs.append(u)
    return jnp.concatenate(outs, axis=-1)


if __name__ == "__main__":
    key = jax.random.PRNGKey(0)
    n = 4
    x = jax.random.normal(key, (2, 4, 16, 16), dtype=jnp.float32)

    fn = jax.jit(functools.partial(legendre_basis, n=n))
    y = fn(x)
    jax.block_until_ready(y)

    y_ref = legendre_reference(x, n)
    assert y.shape == x.shape[:-1] + (n * x.shape[-1],)
    assert y.dtype == x.dtype
    assert bool(jnp.allclose(y, y_ref, rtol=1e-3, atol=1e-3))

    print("KERNEL_OK")
</pallas_src>

<mosaic_0001>
module attributes {stable_mosaic.version = 11 : i64} {
  func.func @_legendre_kernel(%arg0: i32, %arg1: memref<128x16xf32, #tpu.memory_space<vmem>>, %arg2: memref<128x4x16xf32, #tpu.memory_space<vmem>>) attributes {dimension_semantics = [#tpu.dimension_semantics<parallel>], iteration_bounds = array<i64: 1>, scalar_prefetch = 0 : i64, scratch_operands = 0 : i64, tpu.core_type = #tpu.core_type<tc>, window_params = [{transform_indices = @transform_0, window_bounds = array<i64: 128, 16>}, {transform_indices = @transform_1, window_bounds = array<i64: 128, 4, 16>}]} {
    %c0 = arith.constant 0 : index
    %c0_0 = arith.constant 0 : index
    %0 = vector.load %arg1[%c0, %c0_0] : memref<128x16xf32, #tpu.memory_space<vmem>>, vector<128x16xf32>
    %cst = arith.constant 1.000000e+00 : f32
    %1 = vector.broadcast %cst : f32 to vector<128x16xf32>
    %c0_1 = arith.constant 0 : index
    %c0_2 = arith.constant 0 : index
    %c0_3 = arith.constant 0 : index
    %2 = vector.load %arg2[%c0_1, %c0_2, %c0_3] : memref<128x4x16xf32, #tpu.memory_space<vmem>>, vector<128x1x16xf32>
    %3 = vector.shape_cast %2 : vector<128x1x16xf32> to vector<128x16xf32>
    %4 = vector.shape_cast %1 : vector<128x16xf32> to vector<128x1x16xf32>
    tpu.vector_store %arg2[%c0_1, %c0_2, %c0_3], %4 {strides = array<i32>} : memref<128x4x16xf32, #tpu.memory_space<vmem>>, vector<128x1x16xf32>,
    %c0_4 = arith.constant 0 : index
    %c1 = arith.constant 1 : index
    %c0_5 = arith.constant 0 : index
    %5 = vector.load %arg2[%c0_4, %c1, %c0_5] : memref<128x4x16xf32, #tpu.memory_space<vmem>>, vector<128x1x16xf32>
    %6 = vector.shape_cast %5 : vector<128x1x16xf32> to vector<128x16xf32>
    %7 = vector.shape_cast %0 : vector<128x16xf32> to vector<128x1x16xf32>
    tpu.vector_store %arg2[%c0_4, %c1, %c0_5], %7 {strides = array<i32>} : memref<128x4x16xf32, #tpu.memory_space<vmem>>, vector<128x1x16xf32>,
    %cst_6 = arith.constant 3.000000e+00 : f32
    %8 = vector.broadcast %cst_6 : f32 to vector<128x16xf32>
    %9 = arith.mulf %8, %0 : vector<128x16xf32>
    %10 = arith.mulf %9, %0 : vector<128x16xf32>
    %cst_7 = arith.constant 1.000000e+00 : f32
    %11 = vector.broadcast %cst_7 : f32 to vector<128x16xf32>
    %12 = arith.mulf %11, %1 : vector<128x16xf32>
    %13 = arith.subf %10, %12 : vector<128x16xf32>
    %cst_8 = arith.constant 5.000000e-01 : f32
    %14 = vector.broadcast %cst_8 : f32 to vector<128x16xf32>
    %15 = arith.mulf %13, %14 : vector<128x16xf32>
    %c0_9 = arith.constant 0 : index
    %c2 = arith.constant 2 : index
    %c0_10 = arith.constant 0 : index
    %16 = vector.load %arg2[%c0_9, %c2, %c0_10] : memref<128x4x16xf32, #tpu.memory_space<vmem>>, vector<128x1x16xf32>
    %17 = vector.shape_cast %16 : vector<128x1x16xf32> to vector<128x16xf32>
    %18 = vector.shape_cast %15 : vector<128x16xf32> to vector<128x1x16xf32>
    tpu.vector_store %arg2[%c0_9, %c2, %c0_10], %18 {strides = array<i32>} : memref<128x4x16xf32, #tpu.memory_space<vmem>>, vector<128x1x16xf32>,
    %cst_11 = arith.constant 5.000000e+00 : f32
    %19 = vector.broadcast %cst_11 : f32 to vector<128x16xf32>
    %20 = arith.mulf %19, %0 : vector<128x16xf32>
    %21 = arith.mulf %20, %15 : vector<128x16xf32>
    %cst_12 = arith.constant 2.000000e+00 : f32
    %22 = vector.broadcast %cst_12 : f32 to vector<128x16xf32>
    %23 = arith.mulf %22, %0 : vector<128x16xf32>
    %24 = arith.subf %21, %23 : vector<128x16xf32>
    %cst_13 = arith.constant 0.333333343 : f32
    %25 = vector.broadcast %cst_13 : f32 to vector<128x16xf32>
    %26 = arith.mulf %24, %25 : vector<128x16xf32>
    %c0_14 = arith.constant 0 : index
    %c3 = arith.constant 3 : index
    %c0_15 = arith.constant 0 : index
    %27 = vector.load %arg2[%c0_14, %c3, %c0_15] : memref<128x4x16xf32, #tpu.memory_space<vmem>>, vector<128x1x16xf32>
    %28 = vector.shape_cast %27 : vector<128x1x16xf32> to vector<128x16xf32>
    %29 = vector.shape_cast %26 : vector<128x16xf32> to vector<128x1x16xf32>
    tpu.vector_store %arg2[%c0_14, %c3, %c0_15], %29 {strides = array<i32>} : memref<128x4x16xf32, #tpu.memory_space<vmem>>, vector<128x1x16xf32>,
    return
  }
  func.func @transform_0(%arg0: i32) -> (i32, i32) {
    %c0_i32 = arith.constant 0 : i32
    %c0_i32_0 = arith.constant 0 : i32
    return %arg0, %c0_i32 : i32, i32
  }
  func.func @transform_1(%arg0: i32) -> (i32, i32, i32) {
    %c0_i32 = arith.constant 0 : i32
    %c0_i32_0 = arith.constant 0 : i32
    %c0_i32_1 = arith.constant 0 : i32
    return %arg0, %c0_i32, %c0_i32_0 : i32, i32, i32
  }
}

</mosaic_0001>

<bundles_post_ra>
// kernel: legendre_basis.1
= control target key start
LH: loop header
LB: loop body
LE: loop exit
PB: predicated region body
PF: predicated region fallthrough
CT: control target
= control target key end

     0   :  { %6 = vsyncpa [#allocation3], 0  ;;  %s3543_s6 = smov [#allocation2]   ;;  %s6275_s0 = inlined_call_operand.hbm [shape: f32[128,16], index: 0, kind: input, shape index: {}]   ;;  %s6276_s1 = inlined_call_operand.vmem [shape: f32[128,4,16], index: 1, kind: output, shape index: {}]  }
   0x1   :  { %s12_s7 = sshll.u32 %s3543_s6, 4  ;;  %s13_s7 = int_to_ptr.vmem [resolvable:$true] %s12_s7 }
   0x2   :  { %s3529_s8 = scalar_lea.vmem %s13_s7, 2048  ;;  %p3534_p1 = scmp.lt.s32.totalorder %s13_s7, %s13_s7 }
   0x3   :  { %p3530_p0 = scmp.ne.s32.totalorder %s13_s7, %s3529_s8  ;;  %p3535_p2 = scmp.lt.s32.totalorder %s3529_s8, %s3529_s8 }
   0x5   :  { %p3536_p3 = por %p3535_p2, %p3534_p1 }
   0x7   :  { %p3537_p4 = pnand %p3536_p3, %p3530_p0 }
   0x9   :  { %3540 = shalt.err (!%p3537_p4)
}
   0xa   :  { %s3544_s9 = smov 128   ;;  %s3545_s10 = smov 8  }
   0xb   :  { %18 = dma.hbm_to_vmem [thread:$0]  %s6275_s0, 2048, %s13_s7, [#allocation3], %s3544_s9, %s3544_s9, %s3545_s10  }
   0xc   :  { %3541 = dma.done.wait [#allocation3], 2048  }
   0xd   :  { %3542 = vsyncadd [#allocation3], 4294965248  ;;  %vm38_vm0 = vcmask 122880   ;;  %v187_v0 = vlaneseq  ;;  %v3546_v1 = vmov 1.0   ;;  %v3547_v2 = vmov 1966171168  }
   0xe   :  { %39 = vst.msk [vmem:[%s6276_s1] sm:$0x1] %vm38_vm0, %v3546_v1  ;;  %40 = vst.msk [vmem:[%s6276_s1 + $0x4] sm:$0x1] %vm38_vm0, %v3546_v1  ;;  %v185_v3 = vunpack.c.l.s4 %v3547_v2  ;;  %v4204_v7 = vld [vmem:[#allocation2] sm:$0xff]  ;;  %v4206_v8 = vld [vmem:[#allocation2 + $0x8] sm:$0xff] }
   0xf   :  { %41 = vst.msk [vmem:[%s6276_s1 + $0x8] sm:$0x1] %vm38_vm0, %v3546_v1  ;;  %42 = vst.msk [vmem:[%s6276_s1 + $0xc] sm:$0x1] %vm38_vm0, %v3546_v1  ;;  %v188_v4 = vshrl.u32 %v187_v0, 7  ;;  %v183_v10 = vcombine.high %v4204_v7, %v4204_v7  ;;  %v232_v12 = vcombine.high %v4206_v8, %v4206_v8  ;;  %v4216_v13 = vld [vmem:[#allocation2 + $0x10] sm:$0xff] }
  0x10   :  { %43 = vst.msk [vmem:[%s6276_s1 + $0x10] sm:$0x1] %vm38_vm0, %v3546_v1  ;;  %44 = vst.msk [vmem:[%s6276_s1 + $0x14] sm:$0x1] %vm38_vm0, %v3546_v1  ;;  %v186_v5 = vunpack.c.0.s8 %v185_v3  ;;  %v4218_v14 = vld [vmem:[#allocation2 + $0x18] sm:$0xff]  ;;  %v281_v16 = vcombine.high %v4216_v13, %v4216_v13  ;;  %v4294_v47 = vld [vmem:[#allocation2 + $0x20] sm:$0xff] }
  0x11   :  { %45 = vst.msk [vmem:[%s6276_s1 + $0x18] sm:$0x1] %vm38_vm0, %v3546_v1  ;;  %46 = vst.msk [vmem:[%s6276_s1 + $0x1c] sm:$0x1] %vm38_vm0, %v3546_v1  ;;  %v330_v18 = vcombine.high %v4218_v14, %v4218_v14  ;;  %v379_v55 = vcombine.high %v4294_v47, %v4294_v47 }
  0x12   :  { %47 = vst.msk [vmem:[%s6276_s1 + $0x20] sm:$0x1] %vm38_vm0, %v3546_v1  ;;  %48 = vst.msk [vmem:[%s6276_s1 + $0x24] sm:$0x1] %vm38_vm0, %v3546_v1  ;;  %v4202_v6 = vsub.s32 %v186_v5, %v188_v4 }
  0x13   :  { %49 = vst.msk [vmem:[%s6276_s1 + $0x28] sm:$0x1] %vm38_vm0, %v3546_v1  ;;  %50 = vst.msk [vmem:[%s6276_s1 + $0x2c] sm:$0x1] %vm38_vm0, %v3546_v1 }
  0x14   :  { %51 = vst.msk [vmem:[%s6276_s1 + $0x30] sm:$0x1] %vm38_vm0, %v3546_v1  ;;  %52 = vst.msk [vmem:[%s6276_s1 + $0x34] sm:$0x1] %vm38_vm0, %v3546_v1  ;;  %v190_v9 = vrot.slane %v4204_v7, %v4202_v6  ;;  %v239_v11 = vrot.slane %v4206_v8, %v4202_v6  ;;  %v288_v15 = vrot.slane %v4216_v13, %v4202_v6 }
  0x15   :  { %53 = vst.msk [vmem:[%s6276_s1 + $0x38] sm:$0x1] %vm38_vm0, %v3546_v1  ;;  %54 = vst.msk [vmem:[%s6276_s1 + $0x3c] sm:$0x1] %vm38_vm0, %v3546_v1  ;;  %v337_v17 = vrot.slane %v4218_v14, %v4202_v6  ;;  %v197_v21 = vrot.slane %v183_v10, %v4202_v6  ;;  %v246_v24 = vrot.slane %v232_v12, %v4202_v6  ;;  %v4372_v12 = vld [vmem:[#allocation2 + $0x30] sm:$0xff] }
  0x16   :  { %55 = vst.msk [vmem:[%s6276_s1 + $0x40] sm:$0x1] %vm38_vm0, %v3546_v1  ;;  %56 = vst.msk [vmem:[%s6276_s1 + $0x44] sm:$0x1] %vm38_vm0, %v3546_v1  ;;  %v206_v19 = vrot.slane %v190_v9, %v4202_v6  ;;  %v198_v20 = vcombine.high %v190_v9, %v190_v9  ;;  %v255_v22 = vrot.slane %v239_v11, %v4202_v6 }
  0x17   :  { %57 = vst.msk [vmem:[%s6276_s1 + $0x48] sm:$0x1] %vm38_vm0, %v3546_v1  ;;  %58 = vst.msk [vmem:[%s6276_s1 + $0x4c] sm:$0x1] %vm38_vm0, %v3546_v1  ;;  %v247_v23 = vcombine.high %v239_v11, %v239_v11  ;;  %v304_v25 = vrot.slane %v288_v15, %v4202_v6  ;;  %v296_v26 = vcombine.high %v288_v15, %v288_v15  ;;  %v4370_v11 = vld [vmem:[#allocation2 + $0x28] sm:$0xff] }
  0x18   :  { %59 = vst.msk [vmem:[%s6276_s1 + $0x50] sm:$0x1] %vm38_vm0, %v3546_v1  ;;  %60 = vst.msk [vmem:[%s6276_s1 + $0x54] sm:$0x1] %vm38_vm0, %v3546_v1  ;;  %v220_v27 = vrot.slane %v198_v20, %v4202_v6  ;;  %v228_v28 = vcombine.high %v206_v19, %v206_v19  ;;  %v213_v29 = vrot.slane %v197_v21, %v4202_v6 }
  0x19   :  { %61 = vst.msk [vmem:[%s6276_s1 + $0x58] sm:$0x1] %vm38_vm0, %v3546_v1  ;;  %62 = vst.msk [vmem:[%s6276_s1 + $0x5c] sm:$0x1] %vm38_vm0, %v3546_v1  ;;  %v199_v30 = vcombine.high %v197_v21, %v197_v21  ;;  %v269_v31 = vrot.slane %v247_v23, %v4202_v6  ;;  %v277_v32 = vcombine.high %v255_v22, %v255_v22 }
  0x1a   :  { %63 = vst.msk [vmem:[%s6276_s1 + $0x60] sm:$0x1] %vm38_vm0, %v3546_v1  ;;  %64 = vst.msk [vmem:[%s6276_s1 + $0x64] sm:$0x1] %vm38_vm0, %v3546_v1  ;;  %v262_v33 = vrot.slane %v246_v24, %v4202_v6  ;;  %v248_v34 = vcombine.high %v246_v24, %v246_v24  ;;  %v230_v35 = vcombine.high %v220_v27, %v220_v27 }
  0x1b   :  { %65 = vst.msk [vmem:[%s6276_s1 + $0x68] sm:$0x1] %vm38_vm0, %v3546_v1  ;;  %66 = vst.msk [vmem:[%s6276_s1 + $0x6c] sm:$0x1] %vm38_vm0, %v3546_v1  ;;  %v227_v36 = vrot.slane %v199_v30, %v4202_v6  ;;  %v229_v37 = vcombine.high %v213_v29, %v213_v29  ;;  %v318_v38 = vrot.slane %v296_v26, %v4202_v6 }
  0x1c   :  { %67 = vst.msk [vmem:[%s6276_s1 + $0x70] sm:$0x1] %vm38_vm0, %v3546_v1  ;;  %68 = vst.msk [vmem:[%s6276_s1 + $0x74] sm:$0x1] %vm38_vm0, %v3546_v1  ;;  %v279_v39 = vcombine.high %v269_v31, %v269_v31  ;;  %v276_v40 = vrot.slane %v248_v34, %v4202_v6  ;;  %v278_v41 = vcombine.high %v262_v33, %v262_v33 }
  0x1d   :  { %69 = vst.msk [vmem:[%s6276_s1 + $0x78] sm:$0x1] %vm38_vm0, %v3546_v1  ;;  %70 = vst.msk [vmem:[%s6276_s1 + $0x7c] sm:$0x1] %vm38_vm0, %v3546_v1  ;;  %v326_v42 = vcombine.high %v304_v25, %v304_v25  ;;  %v231_v43 = vcombine.high %v227_v36, %v227_v36  ;;  %v328_v44 = vcombine.high %v318_v38, %v318_v38 }
  0x1e   :  { %71 = vst.msk [vmem:[%s6276_s1 + $0x80] sm:$0x1] %vm38_vm0, %v3546_v1  ;;  %72 = vst.msk [vmem:[%s6276_s1 + $0x84] sm:$0x1] %vm38_vm0, %v3546_v1  ;;  %v295_v45 = vrot.slane %v281_v16, %v4202_v6  ;;  %v353_v46 = vrot.slane %v337_v17, %v4202_v6  ;;  %v280_v48 = vcombine.high %v276_v40, %v276_v40 }
  0x1f   :  { %73 = vst.msk [vmem:[%s6276_s1 + $0x88] sm:$0x1] %vm38_vm0, %v3546_v1  ;;  %74 = vst.msk [vmem:[%s6276_s1 + $0x8c] sm:$0x1] %vm38_vm0, %v3546_v1  ;;  %v345_v49 = vcombine.high %v337_v17, %v337_v17  ;;  %v344_v50 = vrot.slane %v330_v18, %v4202_v6  ;;  %v386_v51 = vrot.slane %v4294_v47, %v4202_v6 }
  0x20   :  { %75 = vst.msk [vmem:[%s6276_s1 + $0x90] sm:$0x1] %vm38_vm0, %v3546_v1  ;;  %76 = vst.msk [vmem:[%s6276_s1 + $0x94] sm:$0x1] %vm38_vm0, %v3546_v1  ;;  %v311_v52 = vrot.slane %v295_v45, %v4202_v6  ;;  %v297_v53 = vcombine.high %v295_v45, %v295_v45  ;;  %v375_v54 = vcombine.high %v353_v46, %v353_v46 }
  0x21   :  { %77 = vst.msk [vmem:[%s6276_s1 + $0x98] sm:$0x1] %vm38_vm0, %v3546_v1  ;;  %78 = vst.msk [vmem:[%s6276_s1 + $0x9c] sm:$0x1] %vm38_vm0, %v3546_v1  ;;  %v367_v56 = vrot.slane %v345_v49, %v4202_v6  ;;  %v360_v57 = vrot.slane %v344_v50, %v4202_v6  ;;  %v346_v58 = vcombine.high %v344_v50, %v344_v50  ;;  %v4478_v49 = vld [vmem:[#allocation2 + $0x40] sm:$0xff] }
  0x22   :  { %79 = vst.msk [vmem:[%s6276_s1 + $0xa0] sm:$0x1] %vm38_vm0, %v3546_v1  ;;  %80 = vst.msk [vmem:[%s6276_s1 + $0xa4] sm:$0x1] %vm38_vm0, %v3546_v1  ;;  %v402_v59 = vrot.slane %v386_v51, %v4202_v6  ;;  %v325_v60 = vrot.slane %v297_v53, %v4202_v6  ;;  %v327_v61 = vcombine.high %v311_v52, %v311_v52 }
  0x23   :  { %81 = vst.msk [vmem:[%s6276_s1 + $0xa8] sm:$0x1] %vm38_vm0, %v3546_v1  ;;  %82 = vst.msk [vmem:[%s6276_s1 + $0xac] sm:$0x1] %vm38_vm0, %v3546_v1  ;;  %v394_v62 = vcombine.high %v386_v51, %v386_v51  ;;  %v393_v63 = vrot.slane %v379_v55, %v4202_v6  ;;  %v377_v0 = vcombine.high %v367_v56, %v367_v56 }
  0x24   :  { %83 = vst.msk [vmem:[%s6276_s1 + $0xb0] sm:$0x1] %vm38_vm0, %v3546_v1  ;;  %84 = vst.msk [vmem:[%s6276_s1 + $0xb4] sm:$0x1] %vm38_vm0, %v3546_v1  ;;  %v376_v2 = vcombine.high %v360_v57, %v360_v57  ;;  %v424_v3 = vcombine.high %v402_v59, %v402_v59  ;;  %v329_v4 = vcombine.high %v325_v60, %v325_v60 }
  0x25   :  { %85 = vst.msk [vmem:[%s6276_s1 + $0xb8] sm:$0x1] %vm38_vm0, %v3546_v1  ;;  %86 = vst.msk [vmem:[%s6276_s1 + $0xbc] sm:$0x1] %vm38_vm0, %v3546_v1  ;;  %v416_v5 = vrot.slane %v394_v62, %v4202_v6  ;;  %v409_v9 = vrot.slane %v393_v63, %v4202_v6  ;;  %v395_v10 = vcombine.high %v393_v63, %v393_v63 }
  0x26   :  { %87 = vst.msk [vmem:[%s6276_s1 + $0xc0] sm:$0x1] %vm38_vm0, %v3546_v1  ;;  %88 = vst.msk [vmem:[%s6276_s1 + $0xc4] sm:$0x1] %vm38_vm0, %v3546_v1  ;;  %v435_v16 = vrot.slane %v4370_v11, %v4202_v6  ;;  %v428_v17 = vcombine.high %v4370_v11, %v4370_v11  ;;  %v484_v18 = vrot.slane %v4372_v12, %v4202_v6 }
  0x27   :  { %89 = vst.msk [vmem:[%s6276_s1 + $0xc8] sm:$0x1] %vm38_vm0, %v3546_v1  ;;  %90 = vst.msk [vmem:[%s6276_s1 + $0xcc] sm:$0x1] %vm38_vm0, %v3546_v1  ;;  %v423_v20 = vrot.slane %v395_v10, %v4202_v6  ;;  %v425_v21 = vcombine.high %v409_v9, %v409_v9  ;;  %v582_v53 = vrot.slane %v4478_v49, %v4202_v6 }
  0x28   :  { %91 = vst.msk [vmem:[%s6276_s1 + $0xd0] sm:$0x1] %vm38_vm0, %v3546_v1  ;;  %92 = vst.msk [vmem:[%s6276_s1 + $0xd4] sm:$0x1] %vm38_vm0, %v3546_v1  ;;  %v451_v23 = vrot.slane %v435_v16, %v4202_v6  ;;  %v443_v24 = vcombine.high %v435_v16, %v435_v16  ;;  %v500_v26 = vrot.slane %v484_v18, %v4202_v6 }
  0x29   :  { %93 = vst.msk [vmem:[%s6276_s1 + $0xd8] sm:$0x1] %vm38_vm0, %v3546_v1  ;;  %94 = vst.msk [vmem:[%s6276_s1 + $0xdc] sm:$0x1] %vm38_vm0, %v3546_v1 }
  0x2a   :  { %95 = vst.msk [vmem:[%s6276_s1 + $0xe0] sm:$0x1] %vm38_vm0, %v3546_v1  ;;  %96 = vst.msk [vmem:[%s6276_s1 + $0xe4] sm:$0x1] %vm38_vm0, %v3546_v1 }
  0x2b   :  { %97 = vst.msk [vmem:[%s6276_s1 + $0xe8] sm:$0x1] %vm38_vm0, %v3546_v1  ;;  %98 = vst.msk [vmem:[%s6276_s1 + $0xec] sm:$0x1] %vm38_vm0, %v3546_v1 }
  0x2c   :  { %99 = vst.msk [vmem:[%s6276_s1 + $0xf0] sm:$0x1] %vm38_vm0, %v3546_v1  ;;  %100 = vst.msk [vmem:[%s6276_s1 + $0xf4] sm:$0x1] %vm38_vm0, %v3546_v1 }
  0x2d   :  { %101 = vst.msk [vmem:[%s6276_s1 + $0xf8] sm:$0x1] %vm38_vm0, %v3546_v1  ;;  %102 = vst.msk [vmem:[%s6276_s1 + $0xfc] sm:$0x1] %vm38_vm0, %v3546_v1 }
  0x2e   :  { %103 = vst.msk [vmem:[%s6276_s1 + $0x100] sm:$0x1] %vm38_vm0, %v3546_v1  ;;  %104 = vst.msk [vmem:[%s6276_s1 + $0x104] sm:$0x1] %vm38_vm0, %v3546_v1 }
  0x2f   :  { %105 = vst.msk [vmem:[%s6276_s1 + $0x108] sm:$0x1] %vm38_vm0, %v3546_v1  ;;  %106 = vst.msk [vmem:[%s6276_s1 + $0x10c] sm:$0x1] %vm38_vm0, %v3546_v1 }
  0x30   :  { %107 = vst.msk [vmem:[%s6276_s1 + $0x110] sm:$0x1] %vm38_vm0, %v3546_v1  ;;  %108 = vst.msk [vmem:[%s6276_s1 + $0x114] sm:$0x1] %vm38_vm0, %v3546_v1 }
  0x31   :  { %109 = vst.msk [vmem:[%s6276_s1 + $0x118] sm:$0x1] %vm38_vm0, %v3546_v1  ;;  %110 = vst.msk [vmem:[%s6276_s1 + $0x11c] sm:$0x1] %vm38_vm0, %v3546_v1 }
  0x32   :  { %111 = vst.msk [vmem:[%s6276_s1 + $0x120] sm:$0x1] %vm38_vm0, %v3546_v1  ;;  %112 = vst.msk [vmem:[%s6276_s1 + $0x124] sm:$0x1] %vm38_vm0, %v3546_v1 }
  0x33   :  { %113 = vst.msk [vmem:[%s6276_s1 + $0x128] sm:$0x1] %vm38_vm0, %v3546_v1  ;;  %114 = vst.msk [vmem:[%s6276_s1 + $0x12c] sm:$0x1] %vm38_vm0, %v3546_v1 }
  0x34   :  { %115 = vst.msk [vmem:[%s6276_s1 + $0x130] sm:$0x1] %vm38_vm0, %v3546_v1  ;;  %116 = vst.msk [vmem:[%s6276_s1 + $0x134] sm:$0x1] %vm38_vm0, %v3546_v1 }
  0x35   :  { %117 = vst.msk [vmem:[%s6276_s1 + $0x138] sm:$0x1] %vm38_vm0, %v3546_v1  ;;  %118 = vst.msk [vmem:[%s6276_s1 + $0x13c] sm:$0x1] %vm38_vm0, %v3546_v1 }
  0x36   :  { %119 = vst.msk [vmem:[%s6276_s1 + $0x140] sm:$0x1] %vm38_vm0, %v3546_v1  ;;  %120 = vst.msk [vmem:[%s6276_s1 + $0x144] sm:$0x1] %vm38_vm0, %v3546_v1 }
  0x37   :  { %121 = vst.msk [vmem:[%s6276_s1 + $0x148] sm:$0x1] %vm38_vm0, %v3546_v1  ;;  %122 = vst.msk [vmem:[%s6276_s1 + $0x14c] sm:$0x1] %vm38_vm0, %v3546_v1 }
  0x38   :  { %123 = vst.msk [vmem:[%s6276_s1 + $0x150] sm:$0x1] %vm38_vm0, %v3546_v1  ;;  %124 = vst.msk [vmem:[%s6276_s1 + $0x154] sm:$0x1] %vm38_vm0, %v3546_v1 }
  0x39   :  { %125 = vst.msk [vmem:[%s6276_s1 + $0x158] sm:$0x1] %vm38_vm0, %v3546_v1  ;;  %126 = vst.msk [vmem:[%s6276_s1 + $0x15c] sm:$0x1] %vm38_vm0, %v3546_v1 }
  0x3a   :  { %127 = vst.msk [vmem:[%s6276_s1 + $0x160] sm:$0x1] %vm38_vm0, %v3546_v1  ;;  %128 = vst.msk [vmem:[%s6276_s1 + $0x164] sm:$0x1] %vm38_vm0, %v3546_v1 }
  0x3b   :  { %129 = vst.msk [vmem:[%s6276_s1 + $0x168] sm:$0x1] %vm38_vm0, %v3546_v1  ;;  %130 = vst.msk [vmem:[%s6276_s1 + $0x16c] sm:$0x1] %vm38_vm0, %v3546_v1 }
  0x3c   :  { %131 = vst.msk [vmem:[%s6276_s1 + $0x170] sm:$0x1] %vm38_vm0, %v3546_v1  ;;  %132 = vst.msk [vmem:[%s6276_s1 + $0x174] sm:$0x1] %vm38_vm0, %v3546_v1 }
  0x3d   :  { %133 = vst.msk [vmem:[%s6276_s1 + $0x178] sm:$0x1] %vm38_vm0, %v3546_v1  ;;  %134 = vst.msk [vmem:[%s6276_s1 + $0x17c] sm:$0x1] %vm38_vm0, %v3546_v1 }
  0x3e   :  { %135 = vst.msk [vmem:[%s6276_s1 + $0x180] sm:$0x1] %vm38_vm0, %v3546_v1  ;;  %136 = vst.msk [vmem:[%s6276_s1 + $0x184] sm:$0x1] %vm38_vm0, %v3546_v1 }
  0x3f   :  { %137 = vst.msk [vmem:[%s6276_s1 + $0x188] sm:$0x1] %vm38_vm0, %v3546_v1  ;;  %138 = vst.msk [vmem:[%s6276_s1 + $0x18c] sm:$0x1] %vm38_vm0, %v3546_v1 }
  0x40   :  { %139 = vst.msk [vmem:[%s6276_s1 + $0x190] sm:$0x1] %vm38_vm0, %v3546_v1  ;;  %140 = vst.msk [vmem:[%s6276_s1 + $0x194] sm:$0x1] %vm38_vm0, %v3546_v1 }
  0x41   :  { %141 = vst.msk [vmem:[%s6276_s1 + $0x198] sm:$0x1] %vm38_vm0, %v3546_v1  ;;  %142 = vst.msk [vmem:[%s6276_s1 + $0x19c] sm:$0x1] %vm38_vm0, %v3546_v1 }
  0x42   :  { %143 = vst.msk [vmem:[%s6276_s1 + $0x1a0] sm:$0x1] %vm38_vm0, %v3546_v1  ;;  %144 = vst.msk [vmem:[%s6276_s1 + $0x1a4] sm:$0x1] %vm38_vm0, %v3546_v1 }
  0x43   :  { %145 = vst.msk [vmem:[%s6276_s1 + $0x1a8] sm:$0x1] %vm38_vm0, %v3546_v1  ;;  %146 = vst.msk [vmem:[%s6276_s1 + $0x1ac] sm:$0x1] %vm38_vm0, %v3546_v1 }
  0x44   :  { %147 = vst.msk [vmem:[%s6276_s1 + $0x1b0] sm:$0x1] %vm38_vm0, %v3546_v1  ;;  %148 = vst.msk [vmem:[%s6276_s1 + $0x1b4] sm:$0x1] %vm38_vm0, %v3546_v1 }
  0x45   :  { %149 = vst.msk [vmem:[%s6276_s1 + $0x1b8] sm:$0x1] %vm38_vm0, %v3546_v1  ;;  %150 = vst.msk [vmem:[%s6276_s1 + $0x1bc] sm:$0x1] %vm38_vm0, %v3546_v1 }
  0x46   :  { %151 = vst.msk [vmem:[%s6276_s1 + $0x1c0] sm:$0x1] %vm38_vm0, %v3546_v1  ;;  %152 = vst.msk [vmem:[%s6276_s1 + $0x1c4] sm:$0x1] %vm38_vm0, %v3546_v1 }
  0x47   :  { %153 = vst.msk [vmem:[%s6276_s1 + $0x1c8] sm:$0x1] %vm38_vm0, %v3546_v1  ;;  %154 = vst.msk [vmem:[%s6276_s1 + $0x1cc] sm:$0x1] %vm38_vm0, %v3546_v1 }
  0x48   :  { %155 = vst.msk [vmem:[%s6276_s1 + $0x1d0] sm:$0x1] %vm38_vm0, %v3546_v1  ;;  %156 = vst.msk [vmem:[%s6276_s1 + $0x1d4] sm:$0x1] %vm38_vm0, %v3546_v1 }
  0x49   :  { %157 = vst.msk [vmem:[%s6276_s1 + $0x1d8] sm:$0x1] %vm38_vm0, %v3546_v1  ;;  %158 = vst.msk [vmem:[%s6276_s1 + $0x1dc] sm:$0x1] %vm38_vm0, %v3546_v1 }
  0x4a   :  { %159 = vst.msk [vmem:[%s6276_s1 + $0x1e0] sm:$0x1] %vm38_vm0, %v3546_v1  ;;  %160 = vst.msk [vmem:[%s6276_s1 + $0x1e4] sm:$0x1] %vm38_vm0, %v3546_v1 }
  0x4b   :  { %161 = vst.msk [vmem:[%s6276_s1 + $0x1e8] sm:$0x1] %vm38_vm0, %v3546_v1  ;;  %162 = vst.msk [vmem:[%s6276_s1 + $0x1ec] sm:$0x1] %vm38_vm0, %v3546_v1 }
  0x4c   :  { %163 = vst.msk [vmem:[%s6276_s1 + $0x1f0] sm:$0x1] %vm38_vm0, %v3546_v1  ;;  %164 = vst.msk [vmem:[%s6276_s1 + $0x1f4] sm:$0x1] %vm38_vm0, %v3546_v1 }
  0x4d   :  { %165 = vst.msk [vmem:[%s6276_s1 + $0x1f8] sm:$0x1] %vm38_vm0, %v3546_v1  ;;  %166 = vst.msk [vmem:[%s6276_s1 + $0x1fc] sm:$0x1] %vm38_vm0, %v3546_v1  ;;  %v374_v1 = vrot.slane %v346_v58, %v4202_v6 }
  0x4e   :  { %1095 = vst.msk [vmem:[%s6276_s1 + $0x1] sm:$0x1] %vm38_vm0, %v206_v19  ;;  %1103 = vst.msk [vmem:[%s6276_s1 + $0x21] sm:$0x1] %vm38_vm0, %v255_v22  ;;  %v426_v19 = vcombine.high %v416_v5, %v416_v5  ;;  %v477_v22 = vcombine.high %v4372_v12, %v4372_v12 }
  0x4f   :  { %1111 = vst.msk [vmem:[%s6276_s1 + $0x41] sm:$0x1] %vm38_vm0, %v304_v25  ;;  %1096 = vst.msk [vmem:[%s6276_s1 + $0x5] sm:$0x1] %vm38_vm0, %v220_v27  ;;  %v378_v15 = vcombine.high %v374_v1, %v374_v1  ;;  %v442_v25 = vrot.slane %v428_v17, %v4202_v6  ;;  %v4418_v27 = vld [vmem:[#allocation2 + $0x38] sm:$0xff] }
  0x50   :  { %1097 = vst.msk [vmem:[%s6276_s1 + $0x9] sm:$0x1] %vm38_vm0, %v228_v28  ;;  %1099 = vst.msk [vmem:[%s6276_s1 + $0x11] sm:$0x1] %vm38_vm0, %v213_v29  ;;  %v427_v28 = vcombine.high %v423_v20, %v423_v20  ;;  %v492_v29 = vcombine.high %v484_v18, %v484_v18  ;;  %v491_v30 = vrot.slane %v477_v22, %v4202_v6  ;;  %v4571_v22 = vld [vmem:[#allocation2 + $0x50] sm:$0xff] }
  0x51   :  { %1104 = vst.msk [vmem:[%s6276_s1 + $0x25] sm:$0x1] %vm38_vm0, %v269_v31  ;;  %1105 = vst.msk [vmem:[%s6276_s1 + $0x29] sm:$0x1] %vm38_vm0, %v277_v32  ;;  %v533_v31 = vrot.slane %v4418_v27, %v4202_v6  ;;  %v465_v32 = vrot.slane %v443_v24, %v4202_v6  ;;  %v458_v34 = vrot.slane %v442_v25, %v4202_v6 }
  0x52   :  { %1107 = vst.msk [vmem:[%s6276_s1 + $0x31] sm:$0x1] %vm38_vm0, %v262_v33  ;;  %1098 = vst.msk [vmem:[%s6276_s1 + $0xd] sm:$0x1] %vm38_vm0, %v230_v35  ;;  %v473_v33 = vcombine.high %v451_v23, %v451_v23  ;;  %v444_v35 = vcombine.high %v442_v25, %v442_v25 }
  0x53   :  { %1100 = vst.msk [vmem:[%s6276_s1 + $0x15] sm:$0x1] %vm38_vm0, %v227_v36  ;;  %1101 = vst.msk [vmem:[%s6276_s1 + $0x19] sm:$0x1] %vm38_vm0, %v229_v37  ;;  %v514_v36 = vrot.slane %v492_v29, %v4202_v6  ;;  %v522_v37 = vcombine.high %v500_v26, %v500_v26 }
  0x54   :  { %1112 = vst.msk [vmem:[%s6276_s1 + $0x45] sm:$0x1] %vm38_vm0, %v318_v38  ;;  %1106 = vst.msk [vmem:[%s6276_s1 + $0x2d] sm:$0x1] %vm38_vm0, %v279_v39  ;;  %v507_v38 = vrot.slane %v491_v30, %v4202_v6  ;;  %v493_v39 = vcombine.high %v491_v30, %v491_v30 }
  0x55   :  { %1108 = vst.msk [vmem:[%s6276_s1 + $0x35] sm:$0x1] %vm38_vm0, %v276_v40  ;;  %1109 = vst.msk [vmem:[%s6276_s1 + $0x39] sm:$0x1] %vm38_vm0, %v278_v41  ;;  %v475_v40 = vcombine.high %v465_v32, %v465_v32  ;;  %v472_v41 = vrot.slane %v444_v35, %v4202_v6 }
  0x56   :  { %1113 = vst.msk [vmem:[%s6276_s1 + $0x49] sm:$0x1] %vm38_vm0, %v326_v42  ;;  %1102 = vst.msk [vmem:[%s6276_s1 + $0x1d] sm:$0x1] %vm38_vm0, %v231_v43  ;;  %v474_v42 = vcombine.high %v458_v34, %v458_v34  ;;  %v549_v43 = vrot.slane %v533_v31, %v4202_v6  ;;  %v521_v45 = vrot.slane %v493_v39, %v4202_v6 }
  0x57   :  { %1114 = vst.msk [vmem:[%s6276_s1 + $0x4d] sm:$0x1] %vm38_vm0, %v328_v44  ;;  %1119 = vst.msk [vmem:[%s6276_s1 + $0x61] sm:$0x1] %vm38_vm0, %v353_v46  ;;  %v524_v44 = vcombine.high %v514_v36, %v514_v36  ;;  %v523_v46 = vcombine.high %v507_v38, %v507_v38  ;;  %v476_v50 = vcombine.high %v472_v41, %v472_v41 }
  0x58   :  { %1110 = vst.msk [vmem:[%s6276_s1 + $0x3d] sm:$0x1] %vm38_vm0, %v280_v48  ;;  %1115 = vst.msk [vmem:[%s6276_s1 + $0x51] sm:$0x1] %vm38_vm0, %v311_v52  ;;  %v541_v48 = vcombine.high %v533_v31, %v533_v31  ;;  %v571_v51 = vcombine.high %v549_v43, %v549_v43  ;;  %v526_v52 = vcombine.high %v4418_v27, %v4418_v27 }
  0x59   :  { %1121 = vst.msk [vmem:[%s6276_s1 + $0x69] sm:$0x1] %vm38_vm0, %v375_v54  ;;  %1120 = vst.msk [vmem:[%s6276_s1 + $0x65] sm:$0x1] %vm38_vm0, %v367_v56  ;;  %v4500_v54 = vld [vmem:[#allocation2 + $0x48] sm:$0xff]  ;;  %v525_v55 = vcombine.high %v521_v45, %v521_v45  ;;  %v673_v31 = vcombine.high %v4571_v22, %v4571_v22 }
  0x5a   :  { %1123 = vst.msk [vmem:[%s6276_s1 + $0x71] sm:$0x1] %vm38_vm0, %v360_v57  ;;  %1127 = vst.msk [vmem:[%s6276_s1 + $0x81] sm:$0x1] %vm38_vm0, %v402_v59  ;;  %v563_v56 = vrot.slane %v541_v48, %v4202_v6  ;;  %v575_v57 = vcombine.high %v4478_v49, %v4478_v49  ;;  %v631_v58 = vrot.slane %v4500_v54, %v4202_v6 }
  0x5b   :  { %1116 = vst.msk [vmem:[%s6276_s1 + $0x55] sm:$0x1] %vm38_vm0, %v325_v60  ;;  %1117 = vst.msk [vmem:[%s6276_s1 + $0x59] sm:$0x1] %vm38_vm0, %v327_v61  ;;  %v540_v59 = vrot.slane %v526_v52, %v4202_v6  ;;  %v598_v60 = vrot.slane %v582_v53, %v4202_v6  ;;  %v590_v61 = vcombine.high %v582_v53, %v582_v53 }
  0x5c   :  { %1122 = vst.msk [vmem:[%s6276_s1 + $0x6d] sm:$0x1] %vm38_vm0, %v377_v0  ;;  %1124 = vst.msk [vmem:[%s6276_s1 + $0x75] sm:$0x1] %vm38_vm0, %v374_v1  ;;  %v624_v62 = vcombine.high %v4500_v54, %v4500_v54  ;;  %v573_v63 = vcombine.high %v563_v56, %v563_v56  ;;  %v589_v0 = vrot.slane %v575_v57, %v4202_v6 }
  0x5d   :  { %1125 = vst.msk [vmem:[%s6276_s1 + $0x79] sm:$0x1] %vm38_vm0, %v376_v2  ;;  %1129 = vst.msk [vmem:[%s6276_s1 + $0x89] sm:$0x1] %vm38_vm0, %v424_v3  ;;  %v647_v1 = vrot.slane %v631_v58, %v4202_v6  ;;  %v639_v2 = vcombine.high %v631_v58, %v631_v58  ;;  %v556_v3 = vrot.slane %v540_v59, %v4202_v6 }
  0x5e   :  { %1118 = vst.msk [vmem:[%s6276_s1 + $0x5d] sm:$0x1] %vm38_vm0, %v329_v4  ;;  %1128 = vst.msk [vmem:[%s6276_s1 + $0x85] sm:$0x1] %vm38_vm0, %v416_v5  ;;  %v542_v4 = vcombine.high %v540_v59, %v540_v59  ;;  %v612_v5 = vrot.slane %v590_v61, %v4202_v6  ;;  %v605_v10 = vrot.slane %v589_v0, %v4202_v6 }
  0x5f   :  { %1131 = vst.msk [vmem:[%s6276_s1 + $0x91] sm:$0x1] %vm38_vm0, %v409_v9  ;;  %1126 = vst.msk [vmem:[%s6276_s1 + $0x7d] sm:$0x1] %vm38_vm0, %v378_v15  ;;  %v620_v9 = vcombine.high %v598_v60, %v598_v60  ;;  %v591_v15 = vcombine.high %v589_v0, %v589_v0  ;;  %v661_v16 = vrot.slane %v639_v2, %v4202_v6 }
  0x60   :  { %1130 = vst.msk [vmem:[%s6276_s1 + $0x8d] sm:$0x1] %vm38_vm0, %v426_v19  ;;  %1132 = vst.msk [vmem:[%s6276_s1 + $0x95] sm:$0x1] %vm38_vm0, %v423_v20  ;;  %v669_v17 = vcombine.high %v647_v1, %v647_v1  ;;  %v570_v18 = vrot.slane %v542_v4, %v4202_v6  ;;  %v572_v19 = vcombine.high %v556_v3, %v556_v3 }
  0x61   :  { %1133 = vst.msk [vmem:[%s6276_s1 + $0x99] sm:$0x1] %vm38_vm0, %v425_v21  ;;  %1135 = vst.msk [vmem:[%s6276_s1 + $0xa1] sm:$0x1] %vm38_vm0, %v451_v23  ;;  %v622_v20 = vcombine.high %v612_v5, %v612_v5  ;;  %v638_v21 = vrot.slane %v624_v62, %v4202_v6  ;;  %v619_v23 = vrot.slane %v591_v15, %v4202_v6 }
  0x62   :  { %1143 = vst.msk [vmem:[%s6276_s1 + $0xc1] sm:$0x1] %vm38_vm0, %v500_v26  ;;  %1134 = vst.msk [vmem:[%s6276_s1 + $0x9d] sm:$0x1] %vm38_vm0, %v427_v28  ;;  %v621_v24 = vcombine.high %v605_v10, %v605_v10  ;;  %v671_v25 = vcombine.high %v661_v16, %v661_v16  ;;  %v680_v26 = vrot.slane %v4571_v22, %v4202_v6 }
  0x63   :  { %1136 = vst.msk [vmem:[%s6276_s1 + $0xa5] sm:$0x1] %vm38_vm0, %v465_v32  ;;  %1137 = vst.msk [vmem:[%s6276_s1 + $0xa9] sm:$0x1] %vm38_vm0, %v473_v33  ;;  %v574_v28 = vcombine.high %v570_v18, %v570_v18  ;;  %v654_v29 = vrot.slane %v638_v21, %v4202_v6  ;;  %v640_v30 = vcombine.high %v638_v21, %v638_v21  ;;  %v4603_v32 = vld [vmem:[#allocation2 + $0x58] sm:$0xff] }
  0x64   :  { %1139 = vst.msk [vmem:[%s6276_s1 + $0xb1] sm:$0x1] %vm38_vm0, %v458_v34  ;;  %1144 = vst.msk [vmem:[%s6276_s1 + $0xc5] sm:$0x1] %vm38_vm0, %v514_v36  ;;  %v623_v33 = vcombine.high %v619_v23, %v619_v23  ;;  %v696_v34 = vrot.slane %v680_v26, %v4202_v6  ;;  %v688_v35 = vcombine.high %v680_v26, %v680_v26 }
  0x65   :  { %1145 = vst.msk [vmem:[%s6276_s1 + $0xc9] sm:$0x1] %vm38_vm0, %v522_v37  ;;  %1147 = vst.msk [vmem:[%s6276_s1 + $0xd1] sm:$0x1] %vm38_vm0, %v507_v38  ;;  %v729_v36 = vrot.slane %v4603_v32, %v4202_v6  ;;  %v668_v37 = vrot.slane %v640_v30, %v4202_v6  ;;  %v670_v38 = vcombine.high %v654_v29, %v654_v29 }
  0x66   :  { %1138 = vst.msk [vmem:[%s6276_s1 + $0xad] sm:$0x1] %vm38_vm0, %v475_v40  ;;  %1140 = vst.msk [vmem:[%s6276_s1 + $0xb5] sm:$0x1] %vm38_vm0, %v472_v41  ;;  %v687_v39 = vrot.slane %v673_v31, %v4202_v6  ;;  %v722_v40 = vcombine.high %v4603_v32, %v4603_v32  ;;  %v710_v41 = vrot.slane %v688_v35, %v4202_v6 }
  0x67   :  { %1141 = vst.msk [vmem:[%s6276_s1 + $0xb9] sm:$0x1] %vm38_vm0, %v474_v42  ;;  %1151 = vst.msk [vmem:[%s6276_s1 + $0xe1] sm:$0x1] %vm38_vm0, %v549_v43  ;;  %v718_v42 = vcombine.high %v696_v34, %v696_v34  ;;  %v745_v43 = vrot.slane %v729_v36, %v4202_v6 }
  0x68   :  { %1146 = vst.msk [vmem:[%s6276_s1 + $0xcd] sm:$0x1] %vm38_vm0, %v524_v44  ;;  %1148 = vst.msk [vmem:[%s6276_s1 + $0xd5] sm:$0x1] %vm38_vm0, %v521_v45  ;;  %v737_v44 = vcombine.high %v729_v36, %v729_v36  ;;  %v672_v45 = vcombine.high %v668_v37, %v668_v37  ;;  %v689_v48 = vcombine.high %v687_v39, %v687_v39 }
  0x69   :  { %1149 = vst.msk [vmem:[%s6276_s1 + $0xd9] sm:$0x1] %vm38_vm0, %v523_v46  ;;  %1142 = vst.msk [vmem:[%s6276_s1 + $0xbd] sm:$0x1] %vm38_vm0, %v476_v50  ;;  %v703_v46 = vrot.slane %v687_v39, %v4202_v6  ;;  %v736_v50 = vrot.slane %v722_v40, %v4202_v6  ;;  %v720_v52 = vcombine.high %v710_v41, %v710_v41 }
  0x6a   :  { %1153 = vst.msk [vmem:[%s6276_s1 + $0xe9] sm:$0x1] %vm38_vm0, %v571_v51  ;;  %1150 = vst.msk [vmem:[%s6276_s1 + $0xdd] sm:$0x1] %vm38_vm0, %v525_v55  ;;  %v4652_v51 = vld [vmem:[#allocation2 + $0x60] sm:$0xff]  ;;  %v759_v53 = vrot.slane %v737_v44, %v4202_v6  ;;  %v767_v55 = vcombine.high %v745_v43, %v745_v43  ;;  %v717_v57 = vrot.slane %v689_v48, %v4202_v6 }
  0x6b   :  { %1152 = vst.msk [vmem:[%s6276_s1 + $0xe5] sm:$0x1] %vm38_vm0, %v563_v56  ;;  %1159 = vst.msk [vmem:[%s6276_s1 + $0x101] sm:$0x1] %vm38_vm0, %v598_v60  ;;  %v778_v56 = vrot.slane %v4652_v51, %v4202_v6  ;;  %v719_v58 = vcombine.high %v703_v46, %v703_v46  ;;  %v752_v59 = vrot.slane %v736_v50, %v4202_v6 }
  0x6c   :  { %1154 = vst.msk [vmem:[%s6276_s1 + $0xed] sm:$0x1] %vm38_vm0, %v573_v63  ;;  %1167 = vst.msk [vmem:[%s6276_s1 + $0x121] sm:$0x1] %vm38_vm0, %v647_v1  ;;  %v738_v60 = vcombine.high %v736_v50, %v736_v50  ;;  %v769_v61 = vcombine.high %v759_v53, %v759_v53  ;;  %v771_v0 = vcombine.high %v4652_v51, %v4652_v51  ;;  %v4694_v1 = vld [vmem:[#allocation2 + $0x68] sm:$0xff] }
  0x6d   :  { %1155 = vst.msk [vmem:[%s6276_s1 + $0xf1] sm:$0x1] %vm38_vm0, %v556_v3  ;;  %1160 = vst.msk [vmem:[%s6276_s1 + $0x105] sm:$0x1] %vm38_vm0, %v612_v5  ;;  %v794_v62 = vrot.slane %v778_v56, %v4202_v6  ;;  %v786_v63 = vcombine.high %v778_v56, %v778_v56  ;;  %v721_v2 = vcombine.high %v717_v57, %v717_v57 }
  0x6e   :  { %1161 = vst.msk [vmem:[%s6276_s1 + $0x109] sm:$0x1] %vm38_vm0, %v620_v9  ;;  %1163 = vst.msk [vmem:[%s6276_s1 + $0x111] sm:$0x1] %vm38_vm0, %v605_v10  ;;  %v766_v3 = vrot.slane %v738_v60, %v4202_v6  ;;  %v768_v4 = vcombine.high %v752_v59, %v752_v59  ;;  %v827_v5 = vrot.slane %v4694_v1, %v4202_v6 }
  0x6f   :  { %1168 = vst.msk [vmem:[%s6276_s1 + $0x125] sm:$0x1] %vm38_vm0, %v661_v16  ;;  %1169 = vst.msk [vmem:[%s6276_s1 + $0x129] sm:$0x1] %vm38_vm0, %v669_v17  ;;  %v808_v9 = vrot.slane %v786_v63, %v4202_v6  ;;  %v816_v10 = vcombine.high %v794_v62, %v794_v62  ;;  %v785_v15 = vrot.slane %v771_v0, %v4202_v6  ;;  %v4723_v17 = vld [vmem:[#allocation2 + $0x70] sm:$0xff] }
  0x70   :  { %1156 = vst.msk [vmem:[%s6276_s1 + $0xf5] sm:$0x1] %vm38_vm0, %v570_v18  ;;  %1157 = vst.msk [vmem:[%s6276_s1 + $0xf9] sm:$0x1] %vm38_vm0, %v572_v19  ;;  %v820_v16 = vcombine.high %v4694_v1, %v4694_v1  ;;  %v770_v18 = vcombine.high %v766_v3, %v766_v3  ;;  %v843_v19 = vrot.slane %v827_v5, %v4202_v6 }
  0x71   :  { %1162 = vst.msk [vmem:[%s6276_s1 + $0x10d] sm:$0x1] %vm38_vm0, %v622_v20  ;;  %1164 = vst.msk [vmem:[%s6276_s1 + $0x115] sm:$0x1] %vm38_vm0, %v619_v23  ;;  %v835_v20 = vcombine.high %v827_v5, %v827_v5  ;;  %v876_v21 = vrot.slane %v4723_v17, %v4202_v6  ;;  %v818_v23 = vcombine.high %v808_v9, %v808_v9 }
  0x72   :  { %1165 = vst.msk [vmem:[%s6276_s1 + $0x119] sm:$0x1] %vm38_vm0, %v621_v24  ;;  %1170 = vst.msk [vmem:[%s6276_s1 + $0x12d] sm:$0x1] %vm38_vm0, %v671_v25  ;;  %v801_v24 = vrot.slane %v785_v15, %v4202_v6  ;;  %v787_v25 = vcombine.high %v785_v15, %v785_v15  ;;  %v834_v26 = vrot.slane %v820_v16, %v4202_v6 }
  0x73   :  { %1158 = vst.msk [vmem:[%s6276_s1 + $0xfd] sm:$0x1] %vm38_vm0, %v574_v28  ;;  %1171 = vst.msk [vmem:[%s6276_s1 + $0x131] sm:$0x1] %vm38_vm0, %v654_v29  ;;  %v857_v28 = vrot.slane %v835_v20, %v4202_v6  ;;  %v865_v29 = vcombine.high %v843_v19, %v843_v19  ;;  %v892_v30 = vrot.slane %v876_v21, %v4202_v6 }
  0x74   :  { %1166 = vst.msk [vmem:[%s6276_s1 + $0x11d] sm:$0x1] %vm38_vm0, %v623_v33  ;;  %1175 = vst.msk [vmem:[%s6276_s1 + $0x141] sm:$0x1] %vm38_vm0, %v696_v34  ;;  %v884_v31 = vcombine.high %v876_v21, %v876_v21  ;;  %v815_v33 = vrot.slane %v787_v25, %v4202_v6  ;;  %v817_v34 = vcombine.high %v801_v24, %v801_v24 }
  0x75   :  { %1172 = vst.msk [vmem:[%s6276_s1 + $0x135] sm:$0x1] %vm38_vm0, %v668_v37  ;;  %1173 = vst.msk [vmem:[%s6276_s1 + $0x139] sm:$0x1] %vm38_vm0, %v670_v38  ;;  %v850_v35 = vrot.slane %v834_v26, %v4202_v6  ;;  %v836_v36 = vcombine.high %v834_v26, %v834_v26  ;;  %v867_v37 = vcombine.high %v857_v28, %v857_v28 }
  0x76   :  { %1176 = vst.msk [vmem:[%s6276_s1 + $0x145] sm:$0x1] %vm38_vm0, %v710_v41  ;;  %1177 = vst.msk [vmem:[%s6276_s1 + $0x149] sm:$0x1] %vm38_vm0, %v718_v42  ;;  %v906_v38 = vrot.slane %v884_v31, %v4202_v6  ;;  %v914_v39 = vcombine.high %v892_v30, %v892_v30  ;;  %v869_v40 = vcombine.high %v4723_v17, %v4723_v17  ;;  %v4785_v41 = vld [vmem:[#allocation2 + $0x78] sm:$0xff] }
  0x77   :  { %1183 = vst.msk [vmem:[%s6276_s1 + $0x161] sm:$0x1] %vm38_vm0, %v745_v43  ;;  %1174 = vst.msk [vmem:[%s6276_s1 + $0x13d] sm:$0x1] %vm38_vm0, %v672_v45  ;;  %v819_v42 = vcombine.high %v815_v33, %v815_v33  ;;  %v864_v43 = vrot.slane %v836_v36, %v4202_v6  ;;  %v866_v44 = vcombine.high %v850_v35, %v850_v35 }
  0x78   :  { %1179 = vst.msk [vmem:[%s6276_s1 + $0x151] sm:$0x1] %vm38_vm0, %v703_v46  ;;  %1178 = vst.msk [vmem:[%s6276_s1 + $0x14d] sm:$0x1] %vm38_vm0, %v720_v52  ;;  %v925_v45 = vrot.slane %v4785_v41, %v4202_v6  ;;  %v916_v46 = vcombine.high %v906_v38, %v906_v38  ;;  %v883_v48 = vrot.slane %v869_v40, %v4202_v6  ;;  %v1223_v52 = vmul.f32 3.0, %v4204_v7 }
  0x79   :  { %1184 = vst.msk [vmem:[%s6276_s1 + $0x165] sm:$0x1] %vm38_vm0, %v759_v53  ;;  %1185 = vst.msk [vmem:[%s6276_s1 + $0x169] sm:$0x1] %vm38_vm0, %v767_v55  ;;  %v918_v50 = vcombine.high %v4785_v41, %v4785_v41  ;;  %v868_v53 = vcombine.high %v864_v43, %v864_v43 }
  0x7a   :  { %1180 = vst.msk [vmem:[%s6276_s1 + $0x155] sm:$0x1] %vm38_vm0, %v717_v57  ;;  %1181 = vst.msk [vmem:[%s6276_s1 + $0x159] sm:$0x1] %vm38_vm0, %v719_v58  ;;  %v941_v55 = vrot.slane %v925_v45, %v4202_v6  ;;  %v933_v56 = vcombine.high %v925_v45, %v925_v45  ;;  %v1224_v57 = vmul.f32 3.0, %v4206_v8  ;;  %v899_v58 = vrot.slane %v883_v48, %v4202_v6 }
  0x7b   :  { %1187 = vst.msk [vmem:[%s6276_s1 + $0x171] sm:$0x1] %vm38_vm0, %v752_v59  ;;  %1186 = vst.msk [vmem:[%s6276_s1 + $0x16d] sm:$0x1] %vm38_vm0, %v769_v61  ;;  %v885_v59 = vcombine.high %v883_v48, %v883_v48  ;;  %v932_v60 = vrot.slane %v918_v50, %v4202_v6  ;;  %v1239_v61 = vmul.f32 %v1223_v52, %v4204_v7 }
  0x7c   :  { %1191 = vst.msk [vmem:[%s6276_s1 + $0x181] sm:$0x1] %vm38_vm0, %v794_v62  ;;  %1182 = vst.msk [vmem:[%s6276_s1 + $0x15d] sm:$0x1] %vm38_vm0, %v721_v2  ;;  %v955_v62 = vrot.slane %v933_v56, %v4202_v6  ;;  %v963_v63 = vcombine.high %v941_v55, %v941_v55  ;;  %v1240_v0 = vmul.f32 %v1224_v57, %v4206_v8  ;;  %v1225_v2 = vmul.f32 3.0, %v4216_v13 }
  0x7d   :  { %1188 = vst.msk [vmem:[%s6276_s1 + $0x175] sm:$0x1] %vm38_vm0, %v766_v3  ;;  %1189 = vst.msk [vmem:[%s6276_s1 + $0x179] sm:$0x1] %vm38_vm0, %v768_v4  ;;  %v913_v7 = vrot.slane %v885_v59, %v4202_v6  ;;  %v915_v3 = vcombine.high %v899_v58, %v899_v58  ;;  %v948_v4 = vrot.slane %v932_v60, %v4202_v6 }
  0x7e   :  { %1192 = vst.msk [vmem:[%s6276_s1 + $0x185] sm:$0x1] %vm38_vm0, %v808_v9  ;;  %1193 = vst.msk [vmem:[%s6276_s1 + $0x189] sm:$0x1] %vm38_vm0, %v816_v10  ;;  %v934_v5 = vcombine.high %v932_v60, %v932_v60  ;;  %v965_v8 = vcombine.high %v955_v62, %v955_v62  ;;  %v3484_v9 = vadd.f32 -1.0, %v1239_v61  ;;  %v3485_v10 = vadd.f32 -1.0, %v1240_v0 }
  0x7f   :  { %1190 = vst.msk [vmem:[%s6276_s1 + $0x17d] sm:$0x1] %vm38_vm0, %v770_v18  ;;  %1199 = vst.msk [vmem:[%s6276_s1 + $0x1a1] sm:$0x1] %vm38_vm0, %v843_v19  ;;  %v1241_v15 = vmul.f32 %v1225_v2, %v4216_v13  ;;  %v917_v16 = vcombine.high %v913_v7, %v913_v7  ;;  %v964_v19 = vcombine.high %v948_v4, %v948_v4  ;;  %v1226_v13 = vmul.f32 3.0, %v4218_v14 }
  0x80   :  { %1194 = vst.msk [vmem:[%s6276_s1 + $0x18d] sm:$0x1] %vm38_vm0, %v818_v23  ;;  %1195 = vst.msk [vmem:[%s6276_s1 + $0x191] sm:$0x1] %vm38_vm0, %v801_v24  ;;  %v962_v18 = vrot.slane %v934_v5, %v4202_v6  ;;  %v4883_v20 = vmul.f32 0.5, %v3484_v9  ;;  %v4885_v21 = vmul.f32 0.5, %v3485_v10 }
  0x81   :  { %1200 = vst.msk [vmem:[%s6276_s1 + $0x1a5] sm:$0x1] %vm38_vm0, %v857_v28  ;;  %1201 = vst.msk [vmem:[%s6276_s1 + $0x1a9] sm:$0x1] %vm38_vm0, %v865_v29  ;;  %v3486_v23 = vadd.f32 -1.0, %v1241_v15  ;;  %v1227_v24 = vmul.f32 3.0, %v4294_v47  ;;  %v1242_v26 = vmul.f32 %v1226_v13, %v4218_v14 }
  0x82   :  { %1207 = vst.msk [vmem:[%s6276_s1 + $0x1c1] sm:$0x1] %vm38_vm0, %v892_v30  ;;  %1196 = vst.msk [vmem:[%s6276_s1 + $0x195] sm:$0x1] %vm38_vm0, %v815_v33  ;;  %v966_v25 = vcombine.high %v962_v18, %v962_v18  ;;  %v1228_v28 = vmul.f32 3.0, %v4370_v11  ;;  %v4903_v29 = vmul.f32 3.0, %v4372_v12  ;;  %v1310_v30 = vrot.slane %v4883_v20, %v4202_v6 }
  0x83   :  { %1197 = vst.msk [vmem:[%s6276_s1 + $0x199] sm:$0x1] %vm38_vm0, %v817_v34  ;;  %1203 = vst.msk [vmem:[%s6276_s1 + $0x1b1] sm:$0x1] %vm38_vm0, %v850_v35  ;;  %v1303_v31 = vcombine.high %v4883_v20, %v4883_v20  ;;  %v1359_v33 = vrot.slane %v4885_v21, %v4202_v6  ;;  %v1352_v34 = vcombine.high %v4885_v21, %v4885_v21  ;;  %v4917_v14 = vmul.f32 0.5, %v3486_v23 }
  0x84   :  { %1202 = vst.msk [vmem:[%s6276_s1 + $0x1ad] sm:$0x1] %vm38_vm0, %v867_v37  ;;  %1208 = vst.msk [vmem:[%s6276_s1 + $0x1c5] sm:$0x1] %vm38_vm0, %v906_v38  ;;  %v3487_v35 = vadd.f32 -1.0, %v1242_v26  ;;  %v1243_v36 = vmul.f32 %v1227_v24, %v4294_v47  ;;  %v1244_v37 = vmul.f32 %v1228_v28, %v4370_v11  ;;  %v1326_v38 = vrot.slane %v1310_v30, %v4202_v6 }
  0x85   :  { %1209 = vst.msk [vmem:[%s6276_s1 + $0x1c9] sm:$0x1] %vm38_vm0, %v914_v39  ;;  %1198 = vst.msk [vmem:[%s6276_s1 + $0x19d] sm:$0x1] %vm38_vm0, %v819_v42  ;;  %v1318_v39 = vcombine.high %v1310_v30, %v1310_v30  ;;  %v1317_v40 = vrot.slane %v1303_v31, %v4202_v6  ;;  %v1375_v42 = vrot.slane %v1359_v33, %v4202_v6 }
  0x86   :  { %1204 = vst.msk [vmem:[%s6276_s1 + $0x1b5] sm:$0x1] %vm38_vm0, %v864_v43  ;;  %1205 = vst.msk [vmem:[%s6276_s1 + $0x1b9] sm:$0x1] %vm38_vm0, %v866_v44  ;;  %v1367_v43 = vcombine.high %v1359_v33, %v1359_v33  ;;  %v1366_v44 = vrot.slane %v1352_v34, %v4202_v6  ;;  %v1408_v45 = vrot.slane %v4917_v14, %v4202_v6  ;;  %v3488_v9 = vadd.f32 -1.0, %v1243_v36 }
  0x87   :  { %1210 = vst.msk [vmem:[%s6276_s1 + $0x1cd] sm:$0x1] %vm38_vm0, %v916_v46  ;;  %1206 = vst.msk [vmem:[%s6276_s1 + $0x1bd] sm:$0x1] %vm38_vm0, %v868_v53  ;;  %v1401_v46 = vcombine.high %v4917_v14, %v4917_v14  ;;  %v1340_v47 = vrot.slane %v1318_v39, %v4202_v6  ;;  %v1348_v11 = vcombine.high %v1326_v38, %v1326_v38  ;;  %v3489_v10 = vadd.f32 -1.0, %v1244_v37 }
  0x88   :  { %1215 = vst.msk [vmem:[%s6276_s1 + $0x1e1] sm:$0x1] %vm38_vm0, %v941_v55  ;;  %1211 = vst.msk [vmem:[%s6276_s1 + $0x1d1] sm:$0x1] %vm38_vm0, %v899_v58  ;;  %v1333_v48 = vrot.slane %v1317_v40, %v4202_v6  ;;  %v1319_v50 = vcombine.high %v1317_v40, %v1317_v40  ;;  %v1389_v52 = vrot.slane %v1367_v43, %v4202_v6  ;;  %v5021_v23 = vmul.f32 0.5, %v3488_v9 }
  0x89   :  { %1216 = vst.msk [vmem:[%s6276_s1 + $0x1e5] sm:$0x1] %vm38_vm0, %v955_v62  ;;  %1217 = vst.msk [vmem:[%s6276_s1 + $0x1e9] sm:$0x1] %vm38_vm0, %v963_v63  ;;  %v1397_v53 = vcombine.high %v1375_v42, %v1375_v42  ;;  %v1382_v55 = vrot.slane %v1366_v44, %v4202_v6  ;;  %v1368_v56 = vcombine.high %v1366_v44, %v1366_v44  ;;  %v5023_v24 = vmul.f32 0.5, %v3489_v10 }
  0x8a   :  { %1212 = vst.msk [vmem:[%s6276_s1 + $0x1d5] sm:$0x1] %vm38_vm0, %v913_v7  ;;  %1213 = vst.msk [vmem:[%s6276_s1 + $0x1d9] sm:$0x1] %vm38_vm0, %v915_v3  ;;  %v1350_v57 = vcombine.high %v1340_v47, %v1340_v47  ;;  %v1347_v58 = vrot.slane %v1319_v50, %v4202_v6  ;;  %v1349_v59 = vcombine.high %v1333_v48, %v1333_v48 }
  0x8b   :  { %1219 = vst.msk [vmem:[%s6276_s1 + $0x1f1] sm:$0x1] %vm38_vm0, %v948_v4  ;;  %1218 = vst.msk [vmem:[%s6276_s1 + $0x1ed] sm:$0x1] %vm38_vm0, %v965_v8  ;;  %v1424_v60 = vrot.slane %v1408_v45, %v4202_v6  ;;  %v1399_v61 = vcombine.high %v1389_v52, %v1389_v52  ;;  %v1396_v62 = vrot.slane %v1368_v56, %v4202_v6  ;;  %v4985_v4 = vmul.f32 0.5, %v3487_v35 }
  0x8c   :  { %1214 = vst.msk [vmem:[%s6276_s1 + $0x1dd] sm:$0x1] %vm38_vm0, %v917_v16  ;;  %1220 = vst.msk [vmem:[%s6276_s1 + $0x1f5] sm:$0x1] %vm38_vm0, %v962_v18  ;;  %v1398_v63 = vcombine.high %v1382_v55, %v1382_v55  ;;  %v1416_v0 = vcombine.high %v1408_v45, %v1408_v45  ;;  %v1351_v2 = vcombine.high %v1347_v58, %v1347_v58 }
  0x8d   :  { %1221 = vst.msk [vmem:[%s6276_s1 + $0x1f9] sm:$0x1] %vm38_vm0, %v964_v19  ;;  %1222 = vst.msk [vmem:[%s6276_s1 + $0x1fd] sm:$0x1] %vm38_vm0, %v966_v25  ;;  %v1446_v7 = vcombine.high %v1424_v60, %v1424_v60  ;;  %v1415_v3 = vrot.slane %v1401_v46, %v4202_v6  ;;  %v1400_v5 = vcombine.high %v1396_v62, %v1396_v62 }
  0x8e   :  { %2215 = vst.msk [vmem:[%s6276_s1 + $0x2] sm:$0x1] %vm38_vm0, %v1326_v38  ;;  %2223 = vst.msk [vmem:[%s6276_s1 + $0x22] sm:$0x1] %vm38_vm0, %v1375_v42  ;;  %v1438_v8 = vrot.slane %v1416_v0, %v4202_v6  ;;  %v1457_v18 = vrot.slane %v4985_v4, %v4202_v6  ;;  %v1450_v19 = vcombine.high %v4985_v4, %v4985_v4 }
  0x8f   :  { %2216 = vst.msk [vmem:[%s6276_s1 + $0x6] sm:$0x1] %vm38_vm0, %v1340_v47  ;;  %2217 = vst.msk [vmem:[%s6276_s1 + $0xa] sm:$0x1] %vm38_vm0, %v1348_v11  ;;  %v1431_v15 = vrot.slane %v1415_v3, %v4202_v6  ;;  %v1417_v16 = vcombine.high %v1415_v3, %v1415_v3  ;;  %v1245_v25 = vmul.f32 %v4903_v29, %v4372_v12 }
  0x90   :  { %2219 = vst.msk [vmem:[%s6276_s1 + $0x12] sm:$0x1] %vm38_vm0, %v1333_v48  ;;  %2224 = vst.msk [vmem:[%s6276_s1 + $0x26] sm:$0x1] %vm38_vm0, %v1389_v52  ;;  %v1448_v13 = vcombine.high %v1438_v8, %v1438_v8  ;;  %v1473_v30 = vrot.slane %v1457_v18, %v4202_v6  ;;  %v1465_v31 = vcombine.high %v1457_v18, %v1457_v18 }
  0x91   :  { %2225 = vst.msk [vmem:[%s6276_s1 + $0x2a] sm:$0x1] %vm38_vm0, %v1397_v53  ;;  %2227 = vst.msk [vmem:[%s6276_s1 + $0x32] sm:$0x1] %vm38_vm0, %v1382_v55  ;;  %v1445_v26 = vrot.slane %v1417_v16, %v4202_v6  ;;  %v1447_v28 = vcombine.high %v1431_v15, %v1431_v15  ;;  %v1464_v33 = vrot.slane %v1450_v19, %v4202_v6  ;;  %v1233_v16 = vmul.f32 3.0, %v4571_v22 }
  0x92   :  { %2218 = vst.msk [vmem:[%s6276_s1 + $0xe] sm:$0x1] %vm38_vm0, %v1350_v57  ;;  %2220 = vst.msk [vmem:[%s6276_s1 + $0x16] sm:$0x1] %vm38_vm0, %v1347_v58  ;;  %v1506_v12 = vrot.slane %v5021_v23, %v4202_v6  ;;  %v1499_v29 = vcombine.high %v5021_v23, %v5021_v23  ;;  %v1555_v34 = vrot.slane %v5023_v24, %v4202_v6 }
  0x93   :  { %2221 = vst.msk [vmem:[%s6276_s1 + $0x1a] sm:$0x1] %vm38_vm0, %v1349_v59  ;;  %2231 = vst.msk [vmem:[%s6276_s1 + $0x42] sm:$0x1] %vm38_vm0, %v1424_v60  ;;  %v1449_v35 = vcombine.high %v1445_v26, %v1445_v26  ;;  %v1487_v36 = vrot.slane %v1465_v31, %v4202_v6  ;;  %v1495_v37 = vcombine.high %v1473_v30, %v1473_v30 }
  0x94   :  { %2226 = vst.msk [vmem:[%s6276_s1 + $0x2e] sm:$0x1] %vm38_vm0, %v1399_v61  ;;  %2228 = vst.msk [vmem:[%s6276_s1 + $0x36] sm:$0x1] %vm38_vm0, %v1396_v62  ;;  %v1548_v38 = vcombine.high %v5023_v24, %v5023_v24  ;;  %v1480_v39 = vrot.slane %v1464_v33, %v4202_v6  ;;  %v1466_v40 = vcombine.high %v1464_v33, %v1464_v33  ;;  %v3490_v61 = vadd.f32 -1.0, %v1245_v25 }
  0x95   :  { %2229 = vst.msk [vmem:[%s6276_s1 + $0x3a] sm:$0x1] %vm38_vm0, %v1398_v63  ;;  %2222 = vst.msk [vmem:[%s6276_s1 + $0x1e] sm:$0x1] %vm38_vm0, %v1351_v2  ;;  %v1522_v42 = vrot.slane %v1506_v12, %v4202_v6  ;;  %v1514_v43 = vcombine.high %v1506_v12, %v1506_v12  ;;  %v1497_v44 = vcombine.high %v1487_v36, %v1487_v36  ;;  %v1230_v2 = vmul.f32 3.0, %v4418_v27 }
  0x96   :  { %2233 = vst.msk [vmem:[%s6276_s1 + $0x4a] sm:$0x1] %vm38_vm0, %v1446_v7  ;;  %2230 = vst.msk [vmem:[%s6276_s1 + $0x3e] sm:$0x1] %vm38_vm0, %v1400_v5  ;;  %v1513_v45 = vrot.slane %v1499_v29, %v4202_v6  ;;  %v1571_v46 = vrot.slane %v1555_v34, %v4202_v6  ;;  %v1563_v47 = vcombine.high %v1555_v34, %v1555_v34  ;;  %v5135_v5 = vmul.f32 0.5, %v3490_v61 }
  0x97   :  { %2232 = vst.msk [vmem:[%s6276_s1 + $0x46] sm:$0x1] %vm38_vm0, %v1438_v8  ;;  %2235 = vst.msk [vmem:[%s6276_s1 + $0x52] sm:$0x1] %vm38_vm0, %v1431_v15  ;;  %v1494_v11 = vrot.slane %v1466_v40, %v4202_v6  ;;  %v1496_v48 = vcombine.high %v1480_v39, %v1480_v39  ;;  %v1536_v50 = vrot.slane %v1514_v43, %v4202_v6  ;;  %v1231_v8 = vmul.f32 3.0, %v4478_v49 }
  0x98   :  { %2234 = vst.msk [vmem:[%s6276_s1 + $0x4e] sm:$0x1] %vm38_vm0, %v1448_v13  ;;  %2236 = vst.msk [vmem:[%s6276_s1 + $0x56] sm:$0x1] %vm38_vm0, %v1445_v26  ;;  %v1544_v52 = vcombine.high %v1522_v42, %v1522_v42  ;;  %v1529_v53 = vrot.slane %v1513_v45, %v4202_v6  ;;  %v1515_v55 = vcombine.high %v1513_v45, %v1513_v45  ;;  %v1232_v15 = vmul.f32 3.0, %v4500_v54 }
  0x99   :  { %2237 = vst.msk [vmem:[%s6276_s1 + $0x5a] sm:$0x1] %vm38_vm0, %v1447_v28  ;;  %2239 = vst.msk [vmem:[%s6276_s1 + $0x62] sm:$0x1] %vm38_vm0, %v1473_v30  ;;  %v1585_v56 = vrot.slane %v1563_v47, %v4202_v6  ;;  %v1593_v57 = vcombine.high %v1571_v46, %v1571_v46  ;;  %v1498_v58 = vcombine.high %v1494_v11, %v1494_v11 }
  0x9a   :  { %2238 = vst.msk [vmem:[%s6276_s1 + $0x5e] sm:$0x1] %vm38_vm0, %v1449_v35  ;;  %2240 = vst.msk [vmem:[%s6276_s1 + $0x66] sm:$0x1] %vm38_vm0, %v1487_v36  ;;  %v1546_v59 = vcombine.high %v1536_v50, %v1536_v50  ;;  %v1562_v60 = vrot.slane %v1548_v38, %v4202_v6  ;;  %v1543_v62 = vrot.slane %v1515_v55, %v4202_v6 }
  0x9b   :  { %2241 = vst.msk [vmem:[%s6276_s1 + $0x6a] sm:$0x1] %vm38_vm0, %v1495_v37  ;;  %2243 = vst.msk [vmem:[%s6276_s1 + $0x72] sm:$0x1] %vm38_vm0, %v1480_v39  ;;  %v1545_v63 = vcombine.high %v1529_v53, %v1529_v53  ;;  %v1595_v0 = vcombine.high %v1585_v56, %v1585_v56  ;;  %v1246_v10 = vmul.f32 %v1230_v2, %v4418_v27 }
  0x9c   :  { %2247 = vst.msk [vmem:[%s6276_s1 + $0x82] sm:$0x1] %vm38_vm0, %v1522_v42  ;;  %2242 = vst.msk [vmem:[%s6276_s1 + $0x6e] sm:$0x1] %vm38_vm0, %v1497_v44  ;;  %v1578_v7 = vrot.slane %v1562_v60, %v4202_v6  ;;  %v1564_v3 = vcombine.high %v1562_v60, %v1562_v60  ;;  %v1547_v9 = vcombine.high %v1543_v62, %v1543_v62 }
  0x9d   :  { %2255 = vst.msk [vmem:[%s6276_s1 + $0xa2] sm:$0x1] %vm38_vm0, %v1571_v46  ;;  %2244 = vst.msk [vmem:[%s6276_s1 + $0x76] sm:$0x1] %vm38_vm0, %v1494_v11  ;;  %v1604_v13 = vrot.slane %v5135_v5, %v4202_v6  ;;  %v1597_v25 = vcombine.high %v5135_v5, %v5135_v5  ;;  %v3491_v27 = vadd.f32 -1.0, %v1246_v10  ;;  %v1247_v26 = vmul.f32 %v1231_v8, %v4478_v49 }
  0x9e   :  { %2245 = vst.msk [vmem:[%s6276_s1 + $0x7a] sm:$0x1] %vm38_vm0, %v1496_v48  ;;  %2248 = vst.msk [vmem:[%s6276_s1 + $0x86] sm:$0x1] %vm38_vm0, %v1536_v50  ;;  %v1592_v18 = vrot.slane %v1564_v3, %v4202_v6  ;;  %v1594_v19 = vcombine.high %v1578_v7, %v1578_v7  ;;  %v1248_v28 = vmul.f32 %v1232_v15, %v4500_v54 }
  0x9f   :  { %2249 = vst.msk [vmem:[%s6276_s1 + $0x8a] sm:$0x1] %vm38_vm0, %v1544_v52  ;;  %2251 = vst.msk [vmem:[%s6276_s1 + $0x92] sm:$0x1] %vm38_vm0, %v1529_v53  ;;  %v1249_v30 = vmul.f32 %v1233_v16, %v4571_v22  ;;  %v1620_v33 = vrot.slane %v1604_v13, %v4202_v6  ;;  %v1612_v12 = vcombine.high %v1604_v13, %v1604_v13  ;;  %v5179_v29 = vmul.f32 0.5, %v3491_v27 }
  0xa0   :  { %2256 = vst.msk [vmem:[%s6276_s1 + $0xa6] sm:$0x1] %vm38_vm0, %v1585_v56  ;;  %2257 = vst.msk [vmem:[%s6276_s1 + $0xaa] sm:$0x1] %vm38_vm0, %v1593_v57  ;;  %v1596_v31 = vcombine.high %v1592_v18, %v1592_v18  ;;  %v1611_v49 = vrot.slane %v1597_v25, %v4202_v6  ;;  %v3492_v54 = vadd.f32 -1.0, %v1247_v26  ;;  %v3493_v22 = vadd.f32 -1.0, %v1248_v28 }
  0xa1   :  { %2246 = vst.msk [vmem:[%s6276_s1 + $0x7e] sm:$0x1] %vm38_vm0, %v1498_v58  ;;  %2250 = vst.msk [vmem:[%s6276_s1 + $0x8e] sm:$0x1] %vm38_vm0, %v1546_v59  ;;  %v3494_v34 = vadd.f32 -1.0, %v1249_v30  ;;  %v1634_v35 = vrot.slane %v1612_v12, %v4202_v6  ;;  %v1642_v36 = vcombine.high %v1620_v33, %v1620_v33  ;;  %v1653_v39 = vrot.slane %v5179_v29, %v4202_v6 }
  0xa2   :  { %2252 = vst.msk [vmem:[%s6276_s1 + $0x96] sm:$0x1] %vm38_vm0, %v1543_v62  ;;  %2253 = vst.msk [vmem:[%s6276_s1 + $0x9a] sm:$0x1] %vm38_vm0, %v1545_v63  ;;  %v1627_v37 = vrot.slane %v1611_v49, %v4202_v6  ;;  %v1613_v38 = vcombine.high %v1611_v49, %v1611_v49  ;;  %v1646_v40 = vcombine.high %v5179_v29, %v5179_v29  ;;  %v5195_v42 = vmul.f32 0.5, %v3492_v54 }
  0xa3   :  { %2258 = vst.msk [vmem:[%s6276_s1 + $0xae] sm:$0x1] %vm38_vm0, %v1595_v0  ;;  %2259 = vst.msk [vmem:[%s6276_s1 + $0xb2] sm:$0x1] %vm38_vm0, %v1578_v7  ;;  %v5197_v43 = vmul.f32 0.5, %v3493_v22  ;;  %v1644_v44 = vcombine.high %v1634_v35, %v1634_v35  ;;  %v5212_v47 = vmul.f32 0.5, %v3494_v34  ;;  %v1669_v11 = vrot.slane %v1653_v39, %v4202_v6 }
  0xa4   :  { %2254 = vst.msk [vmem:[%s6276_s1 + $0x9e] sm:$0x1] %vm38_vm0, %v1547_v9  ;;  %2260 = vst.msk [vmem:[%s6276_s1 + $0xb6] sm:$0x1] %vm38_vm0, %v1592_v18  ;;  %v1641_v45 = vrot.slane %v1613_v38, %v4202_v6  ;;  %v1643_v46 = vcombine.high %v1627_v37, %v1627_v37  ;;  %v1661_v48 = vcombine.high %v1653_v39, %v1653_v39 }
  0xa5   :  { %2261 = vst.msk [vmem:[%s6276_s1 + $0xba] sm:$0x1] %vm38_vm0, %v1594_v19  ;;  %2262 = vst.msk [vmem:[%s6276_s1 + $0xbe] sm:$0x1] %vm38_vm0, %v1596_v31  ;;  %v1660_v50 = vrot.slane %v1646_v40, %v4202_v6  ;;  %v1702_v52 = vrot.slane %v5195_v42, %v4202_v6  ;;  %v1695_v55 = vcombine.high %v5195_v42, %v5195_v42  ;;  %v1235_v40 = vmul.f32 3.0, %v4652_v51 }
  0xa6   :  { %2263 = vst.msk [vmem:[%s6276_s1 + $0xc2] sm:$0x1] %vm38_vm0, %v1620_v33  ;;  %2264 = vst.msk [vmem:[%s6276_s1 + $0xc6] sm:$0x1] %vm38_vm0, %v1634_v35  ;;  %v1645_v53 = vcombine.high %v1641_v45, %v1641_v45  ;;  %v1751_v56 = vrot.slane %v5197_v43, %v4202_v6  ;;  %v1744_v57 = vcombine.high %v5197_v43, %v5197_v43 }
  0xa7   :  { %2265 = vst.msk [vmem:[%s6276_s1 + $0xca] sm:$0x1] %vm38_vm0, %v1642_v36  ;;  %2267 = vst.msk [vmem:[%s6276_s1 + $0xd2] sm:$0x1] %vm38_vm0, %v1627_v37  ;;  %v1683_v58 = vrot.slane %v1661_v48, %v4202_v6  ;;  %v1691_v59 = vcombine.high %v1669_v11, %v1669_v11  ;;  %v1676_v60 = vrot.slane %v1660_v50, %v4202_v6  ;;  %v1234_v36 = vmul.f32 3.0, %v4603_v32 }
  0xa8   :  { %2266 = vst.msk [vmem:[%s6276_s1 + $0xce] sm:$0x1] %vm38_vm0, %v1644_v44  ;;  %2268 = vst.msk [vmem:[%s6276_s1 + $0xd6] sm:$0x1] %vm38_vm0, %v1641_v45  ;;  %v1662_v61 = vcombine.high %v1660_v50, %v1660_v50  ;;  %v1718_v62 = vrot.slane %v1702_v52, %v4202_v6  ;;  %v1710_v63 = vcombine.high %v1702_v52, %v1702_v52 }
  0xa9   :  { %2269 = vst.msk [vmem:[%s6276_s1 + $0xda] sm:$0x1] %vm38_vm0, %v1643_v46  ;;  %2271 = vst.msk [vmem:[%s6276_s1 + $0xe2] sm:$0x1] %vm38_vm0, %v1669_v11  ;;  %v1709_v0 = vrot.slane %v1695_v55, %v4202_v6  ;;  %v1767_v2 = vrot.slane %v1751_v56, %v4202_v6  ;;  %v1693_v7 = vcombine.high %v1683_v58, %v1683_v58  ;;  %v1236_v11 = vmul.f32 3.0, %v4694_v1 }
  0xaa   :  { %2270 = vst.msk [vmem:[%s6276_s1 + $0xde] sm:$0x1] %vm38_vm0, %v1645_v53  ;;  %2272 = vst.msk [vmem:[%s6276_s1 + $0xe6] sm:$0x1] %vm38_vm0, %v1683_v58  ;;  %v1690_v3 = vrot.slane %v1662_v61, %v4202_v6  ;;  %v1692_v8 = vcombine.high %v1676_v60, %v1676_v60  ;;  %v1759_v9 = vcombine.high %v1751_v56, %v1751_v56 }
  0xab   :  { %2273 = vst.msk [vmem:[%s6276_s1 + $0xea] sm:$0x1] %vm38_vm0, %v1691_v59  ;;  %2275 = vst.msk [vmem:[%s6276_s1 + $0xf2] sm:$0x1] %vm38_vm0, %v1676_v60  ;;  %v1732_v10 = vrot.slane %v1710_v63, %v4202_v6  ;;  %v1740_v15 = vcombine.high %v1718_v62, %v1718_v62  ;;  %v1725_v16 = vrot.slane %v1709_v0, %v4202_v6  ;;  %v1238_v60 = vmul.f32 3.0, %v4785_v41  ;;  %v3505_v63 = vld [vmem:[#allocation2] sm:$0xff] }
  0xac   :  { %2279 = vst.msk [vmem:[%s6276_s1 + $0x102] sm:$0x1] %vm38_vm0, %v1718_v62  ;;  %v1711_v18 = vcombine.high %v1709_v0, %v1709_v0  ;;  %2287 = vst.msk [vmem:[%s6276_s1 + $0x122] sm:$0x1] %vm38_vm0, %v1767_v2  ;;  %v1694_v19 = vcombine.high %v1690_v3, %v1690_v3  ;;  %v1781_v13 = vrot.slane %v1759_v9, %v4202_v6  ;;  %v2343_v0 = vmul.f32 5.0, %v3505_v63 }
  0xad   :  { %2274 = vst.msk [vmem:[%s6276_s1 + $0xee] sm:$0x1] %vm38_vm0, %v1693_v7  ;;  %2276 = vst.msk [vmem:[%s6276_s1 + $0xf6] sm:$0x1] %vm38_vm0, %v1690_v3  ;;  %v1789_v25 = vcombine.high %v1767_v2, %v1767_v2  ;;  %v1758_v27 = vrot.slane %v1744_v57, %v4202_v6  ;;  %v1742_v26 = vcombine.high %v1732_v10, %v1732_v10  ;;  %v1237_v57 = vmul.f32 3.0, %v4723_v17 }
  0xae   :  { %2277 = vst.msk [vmem:[%s6276_s1 + $0xfa] sm:$0x1] %vm38_vm0, %v1692_v8  ;;  %2280 = vst.msk [vmem:[%s6276_s1 + $0x106] sm:$0x1] %vm38_vm0, %v1732_v10  ;;  %v1739_v28 = vrot.slane %v1711_v18, %v4202_v6  ;;  %v1741_v30 = vcombine.high %v1725_v16, %v1725_v16  ;;  %v1800_v31 = vrot.slane %v5212_v47, %v4202_v6  ;;  %v5400_v8 = vmul.f32 2.0, %v3505_v63 }
  0xaf   :  { %2281 = vst.msk [vmem:[%s6276_s1 + $0x10a] sm:$0x1] %vm38_vm0, %v1740_v15  ;;  %2283 = vst.msk [vmem:[%s6276_s1 + $0x112] sm:$0x1] %vm38_vm0, %v1725_v16  ;;  %v1791_v33 = vcombine.high %v1781_v13, %v1781_v13  ;;  %v1774_v12 = vrot.slane %v1758_v27, %v4202_v6  ;;  %v1760_v49 = vcombine.high %v1758_v27, %v1758_v27 }
  0xb0   :  { %2278 = vst.msk [vmem:[%s6276_s1 + $0xfe] sm:$0x1] %vm38_vm0, %v1694_v19  ;;  %2288 = vst.msk [vmem:[%s6276_s1 + $0x126] sm:$0x1] %vm38_vm0, %v1781_v13  ;;  %v1793_v54 = vcombine.high %v5212_v47, %v5212_v47  ;;  %v1743_v22 = vcombine.high %v1739_v28, %v1739_v28  ;;  %v1816_v34 = vrot.slane %v1800_v31, %v4202_v6 }
  0xb1   :  { %2289 = vst.msk [vmem:[%s6276_s1 + $0x12a] sm:$0x1] %vm38_vm0, %v1789_v25  ;;  %2282 = vst.msk [vmem:[%s6276_s1 + $0x10e] sm:$0x1] %vm38_vm0, %v1742_v26  ;;  %v1808_v35 = vcombine.high %v1800_v31, %v1800_v31  ;;  %v1788_v37 = vrot.slane %v1760_v49, %v4202_v6  ;;  %v1790_v38 = vcombine.high %v1774_v12, %v1774_v12 }
  0xb2   :  { %2284 = vst.msk [vmem:[%s6276_s1 + $0x116] sm:$0x1] %vm38_vm0, %v1739_v28  ;;  %2285 = vst.msk [vmem:[%s6276_s1 + $0x11a] sm:$0x1] %vm38_vm0, %v1741_v30  ;;  %v1807_v39 = vrot.slane %v1793_v54, %v4202_v6  ;;  %v1838_v45 = vcombine.high %v1816_v34, %v1816_v34  ;;  %v1250_v46 = vmul.f32 %v1234_v36, %v4603_v32 }
  0xb3   :  { %2290 = vst.msk [vmem:[%s6276_s1 + $0x12e] sm:$0x1] %vm38_vm0, %v1791_v33  ;;  %2291 = vst.msk [vmem:[%s6276_s1 + $0x132] sm:$0x1] %vm38_vm0, %v1774_v12  ;;  %v1830_v44 = vrot.slane %v1808_v35, %v4202_v6  ;;  %v1792_v48 = vcombine.high %v1788_v37, %v1788_v37  ;;  %v1251_v53 = vmul.f32 %v1235_v40, %v4652_v51 }
  0xb4   :  { %2286 = vst.msk [vmem:[%s6276_s1 + $0x11e] sm:$0x1] %vm38_vm0, %v1743_v22  ;;  %2295 = vst.msk [vmem:[%s6276_s1 + $0x142] sm:$0x1] %vm38_vm0, %v1816_v34  ;;  %v1823_v50 = vrot.slane %v1807_v39, %v4202_v6  ;;  %v1809_v52 = vcombine.high %v1807_v39, %v1807_v39  ;;  %v3495_v55 = vadd.f32 -1.0, %v1250_v46  ;;  %v1252_v56 = vmul.f32 %v1236_v11, %v4694_v1 }
  0xb5   :  { %2292 = vst.msk [vmem:[%s6276_s1 + $0x136] sm:$0x1] %vm38_vm0, %v1788_v37  ;;  %2293 = vst.msk [vmem:[%s6276_s1 + $0x13a] sm:$0x1] %vm38_vm0, %v1790_v38  ;;  %v1840_v32 = vcombine.high %v1830_v44, %v1830_v44  ;;  %v3496_v59 = vadd.f32 -1.0, %v1251_v53  ;;  %v1253_v62 = vmul.f32 %v1237_v57, %v4723_v17  ;;  %v1254_v3 = vmul.f32 %v1238_v60, %v4785_v41 }
  0xb6   :  { %2296 = vst.msk [vmem:[%s6276_s1 + $0x146] sm:$0x1] %vm38_vm0, %v1830_v44  ;;  %2297 = vst.msk [vmem:[%s6276_s1 + $0x14a] sm:$0x1] %vm38_vm0, %v1838_v45  ;;  %v1837_v51 = vrot.slane %v1809_v52, %v4202_v6  ;;  %v1839_v58 = vcombine.high %v1823_v50, %v1823_v50  ;;  %v5386_v1 = vmul.f32 0.5, %v3495_v55  ;;  %v3497_v61 = vadd.f32 -1.0, %v1252_v56 }
  0xb7   :  { %2294 = vst.msk [vmem:[%s6276_s1 + $0x13e] sm:$0x1] %vm38_vm0, %v1792_v48  ;;  %2299 = vst.msk [vmem:[%s6276_s1 + $0x152] sm:$0x1] %vm38_vm0, %v1823_v50  ;;  %v5397_v7 = vmul.f32 0.5, %v3496_v59  ;;  %v3498_v15 = vadd.f32 -1.0, %v1253_v62  ;;  %v2359_v19 = vmul.f32 %v2343_v0, %v4883_v20 }
  0xb8   :  { %2298 = vst.msk [vmem:[%s6276_s1 + $0x14e] sm:$0x1] %vm38_vm0, %v1840_v32  ;;  %2300 = vst.msk [vmem:[%s6276_s1 + $0x156] sm:$0x1] %vm38_vm0, %v1837_v51  ;;  %v1841_v2 = vcombine.high %v1837_v51, %v1837_v51  ;;  %v1849_v17 = vrot.slane %v5386_v1, %v4202_v6  ;;  %v1842_v9 = vcombine.high %v5386_v1, %v5386_v1  ;;  %v5406_v10 = vmul.f32 0.5, %v3497_v61 }
  0xb9   :  { %2301 = vst.msk [vmem:[%s6276_s1 + $0x15a] sm:$0x1] %vm38_vm0, %v1839_v58  ;;  %v1898_v16 = vrot.slane %v5397_v7, %v4202_v6  ;;  %v1891_v41 = vcombine.high %v5397_v7, %v5397_v7  ;;  %v3499_v18 = vadd.f32 -1.0, %v1254_v3  ;;  %v5481_v53 = vmul.f32 0.5, %v3498_v15 }
  0xba   :  { %2302 = vst.msk [vmem:[%s6276_s1 + $0x15e] sm:$0x1] %vm38_vm0, %v1841_v2  ;;  %v1865_v13 = vrot.slane %v1849_v17, %v4202_v6  ;;  %v1857_v25 = vcombine.high %v1849_v17, %v1849_v17  ;;  %v1856_v27 = vrot.slane %v1842_v9, %v4202_v6  ;;  %v1947_v26 = vrot.slane %v5406_v10, %v4202_v6 }
  0xbb   :  { %v1914_v28 = vrot.slane %v1898_v16, %v4202_v6  ;;  %v1906_v30 = vcombine.high %v1898_v16, %v1898_v16  ;;  %v1905_v31 = vrot.slane %v1891_v41, %v4202_v6  ;;  %v1940_v33 = vcombine.high %v5406_v10, %v5406_v10 }
  0xbc   :  { %2303 = vst.msk [vmem:[%s6276_s1 + $0x162] sm:$0x1] %vm38_vm0, %v1865_v13  ;;  %v1879_v20 = vrot.slane %v1857_v25, %v4202_v6  ;;  %v1887_v12 = vcombine.high %v1865_v13, %v1865_v13  ;;  %v1872_v49 = vrot.slane %v1856_v27, %v4202_v6  ;;  %v1858_v54 = vcombine.high %v1856_v27, %v1856_v27 }
  0xbd   :  { %2311 = vst.msk [vmem:[%s6276_s1 + $0x182] sm:$0x1] %vm38_vm0, %v1914_v28  ;;  %v1928_v22 = vrot.slane %v1906_v30, %v4202_v6  ;;  %v1936_v34 = vcombine.high %v1914_v28, %v1914_v28  ;;  %v1921_v35 = vrot.slane %v1905_v31, %v4202_v6  ;;  %v1907_v36 = vcombine.high %v1905_v31, %v1905_v31 }
  0xbe   :  { %2304 = vst.msk [vmem:[%s6276_s1 + $0x166] sm:$0x1] %vm38_vm0, %v1879_v20  ;;  %2305 = vst.msk [vmem:[%s6276_s1 + $0x16a] sm:$0x1] %vm38_vm0, %v1887_v12  ;;  %v1889_v37 = vcombine.high %v1879_v20, %v1879_v20  ;;  %v1886_v38 = vrot.slane %v1858_v54, %v4202_v6  ;;  %v1888_v39 = vcombine.high %v1872_v49, %v1872_v49  ;;  %v5496_v56 = vmul.f32 0.5, %v3499_v18 }
  0xbf   :  { %2307 = vst.msk [vmem:[%s6276_s1 + $0x172] sm:$0x1] %vm38_vm0, %v1872_v49  ;;  %v1963_v40 = vrot.slane %v1947_v26, %v4202_v6  ;;  %2312 = vst.msk [vmem:[%s6276_s1 + $0x186] sm:$0x1] %vm38_vm0, %v1928_v22  ;;  %v1938_v44 = vcombine.high %v1928_v22, %v1928_v22  ;;  %v1935_v45 = vrot.slane %v1907_v36, %v4202_v6 }
  0xc0   :  { %2313 = vst.msk [vmem:[%s6276_s1 + $0x18a] sm:$0x1] %vm38_vm0, %v1936_v34  ;;  %2315 = vst.msk [vmem:[%s6276_s1 + $0x192] sm:$0x1] %vm38_vm0, %v1921_v35  ;;  %v1937_v46 = vcombine.high %v1921_v35, %v1921_v35  ;;  %v1955_v11 = vcombine.high %v1947_v26, %v1947_v26  ;;  %v1890_v48 = vcombine.high %v1886_v38, %v1886_v38 }
  0xc1   :  { %2306 = vst.msk [vmem:[%s6276_s1 + $0x16e] sm:$0x1] %vm38_vm0, %v1889_v37  ;;  %2308 = vst.msk [vmem:[%s6276_s1 + $0x176] sm:$0x1] %vm38_vm0, %v1886_v38  ;;  %v1985_v50 = vcombine.high %v1963_v40, %v1963_v40  ;;  %v1954_v52 = vrot.slane %v1940_v33, %v4202_v6  ;;  %v1939_v32 = vcombine.high %v1935_v45, %v1935_v45 }
  0xc2   :  { %2309 = vst.msk [vmem:[%s6276_s1 + $0x17a] sm:$0x1] %vm38_vm0, %v1888_v39  ;;  %2319 = vst.msk [vmem:[%s6276_s1 + $0x1a2] sm:$0x1] %vm38_vm0, %v1963_v40  ;;  %v1977_v55 = vrot.slane %v1955_v11, %v4202_v6  ;;  %v2391_v57 = vsub.f32 %v2359_v19, %v5400_v8  ;;  %v1996_v59 = vrot.slane %v5481_v53, %v4202_v6 }
  0xc3   :  { %2314 = vst.msk [vmem:[%s6276_s1 + $0x18e] sm:$0x1] %vm38_vm0, %v1938_v44  ;;  %2316 = vst.msk [vmem:[%s6276_s1 + $0x196] sm:$0x1] %vm38_vm0, %v1935_v45  ;;  %v1970_v51 = vrot.slane %v1954_v52, %v4202_v6  ;;  %v1956_v58 = vcombine.high %v1954_v52, %v1954_v52  ;;  %v1989_v60 = vcombine.high %v5481_v53, %v5481_v53  ;;  %v3506_v44 = vld [vmem:[#allocation2 + $0x8] sm:$0xff] }
  0xc4   :  { %2317 = vst.msk [vmem:[%s6276_s1 + $0x19a] sm:$0x1] %vm38_vm0, %v1937_v46  ;;  %2310 = vst.msk [vmem:[%s6276_s1 + $0x17e] sm:$0x1] %vm38_vm0, %v1890_v48  ;;  %v1987_v61 = vcombine.high %v1977_v55, %v1977_v55  ;;  %v2045_v62 = vrot.slane %v5496_v56, %v4202_v6  ;;  %v2038_v63 = vcombine.high %v5496_v56, %v5496_v56  ;;  %v2407_v0 = vmul.f32 0.33333334, %v2391_v57 }
  0xc5   :  { %2321 = vst.msk [vmem:[%s6276_s1 + $0x1aa] sm:$0x1] %vm38_vm0, %v1985_v50  ;;  %2318 = vst.msk [vmem:[%s6276_s1 + $0x19e] sm:$0x1] %vm38_vm0, %v1939_v32  ;;  %v1984_v2 = vrot.slane %v1956_v58, %v4202_v6  ;;  %v1986_v3 = vcombine.high %v1970_v51, %v1970_v51  ;;  %v2012_v8 = vrot.slane %v1996_v59, %v4202_v6  ;;  %v2344_v45 = vmul.f32 5.0, %v3506_v44  ;;  %v3507_v50 = vld [vmem:[#allocation2 + $0x10] sm:$0xff] }
  0xc6   :  { %2320 = vst.msk [vmem:[%s6276_s1 + $0x1a6] sm:$0x1] %vm38_vm0, %v1977_v55  ;;  %2323 = vst.msk [vmem:[%s6276_s1 + $0x1b2] sm:$0x1] %vm38_vm0, %v1970_v51  ;;  %v2004_v17 = vcombine.high %v1996_v59, %v1996_v59  ;;  %v2003_v9 = vrot.slane %v1989_v60, %v4202_v6  ;;  %v2061_v15 = vrot.slane %v2045_v62, %v4202_v6  ;;  %v2376_v46 = vmul.f32 2.0, %v3506_v44  ;;  %v3508_v51 = vld [vmem:[#allocation2 + $0x18] sm:$0xff] }
  0xc7   :  { %2322 = vst.msk [vmem:[%s6276_s1 + $0x1ae] sm:$0x1] %vm38_vm0, %v1987_v61  ;;  %v2053_v16 = vcombine.high %v2045_v62, %v2045_v62  ;;  %v2052_v41 = vrot.slane %v2038_v63, %v4202_v6  ;;  %2324 = vst.msk [vmem:[%s6276_s1 + $0x1b6] sm:$0x1] %vm38_vm0, %v1984_v2  ;;  %v1988_v18 = vcombine.high %v1984_v2, %v1984_v2  ;;  %v2345_v52 = vmul.f32 5.0, %v3507_v50  ;;  %v3509_v63 = vld [vmem:[#allocation2 + $0x20] sm:$0xff] }
  0xc8   :  { %2325 = vst.msk [vmem:[%s6276_s1 + $0x1ba] sm:$0x1] %vm38_vm0, %v1986_v3  ;;  %2327 = vst.msk [vmem:[%s6276_s1 + $0x1c2] sm:$0x1] %vm38_vm0, %v2012_v8  ;;  %v2026_v19 = vrot.slane %v2004_v17, %v4202_v6  ;;  %v2034_v13 = vcombine.high %v2012_v8, %v2012_v8  ;;  %v2446_v25 = vrot.slane %v2407_v0, %v4202_v6  ;;  %v2377_v32 = vmul.f32 2.0, %v3507_v50  ;;  %v3510_v8 = vld [vmem:[#allocation2 + $0x28] sm:$0xff] }
  0xc9   :  { %v2019_v27 = vrot.slane %v2003_v9, %v4202_v6  ;;  %v2005_v26 = vcombine.high %v2003_v9, %v2003_v9  ;;  %2335 = vst.msk [vmem:[%s6276_s1 + $0x1e2] sm:$0x1] %vm38_vm0, %v2061_v15  ;;  %v2075_v28 = vrot.slane %v2053_v16, %v4202_v6  ;;  %v2083_v30 = vcombine.high %v2061_v15, %v2061_v15 }
  0xca   :  { %2326 = vst.msk [vmem:[%s6276_s1 + $0x1be] sm:$0x1] %vm38_vm0, %v1988_v18  ;;  %2328 = vst.msk [vmem:[%s6276_s1 + $0x1c6] sm:$0x1] %vm38_vm0, %v2026_v19  ;;  %v2036_v31 = vcombine.high %v2026_v19, %v2026_v19  ;;  %v2068_v33 = vrot.slane %v2052_v41, %v4202_v6  ;;  %v2054_v20 = vcombine.high %v2052_v41, %v2052_v41  ;;  %v2346_v58 = vmul.f32 5.0, %v3508_v51 }
  0xcb   :  { %2329 = vst.msk [vmem:[%s6276_s1 + $0x1ca] sm:$0x1] %vm38_vm0, %v2034_v13  ;;  %v2462_v12 = vrot.slane %v2446_v25, %v4202_v6  ;;  %2331 = vst.msk [vmem:[%s6276_s1 + $0x1d2] sm:$0x1] %vm38_vm0, %v2019_v27  ;;  %v2033_v49 = vrot.slane %v2005_v26, %v4202_v6  ;;  %v2035_v54 = vcombine.high %v2019_v27, %v2019_v27  ;;  %v2378_v59 = vmul.f32 2.0, %v3508_v51  ;;  %v5662_v27 = vld [vmem:[#allocation2 + $0x30] sm:$0xff] }
  0xcc   :  { %2336 = vst.msk [vmem:[%s6276_s1 + $0x1e6] sm:$0x1] %vm38_vm0, %v2075_v28  ;;  %2337 = vst.msk [vmem:[%s6276_s1 + $0x1ea] sm:$0x1] %vm38_vm0, %v2083_v30  ;;  %v2085_v22 = vcombine.high %v2075_v28, %v2075_v28  ;;  %v2454_v34 = vcombine.high %v2446_v25, %v2446_v25  ;;  %v2082_v35 = vrot.slane %v2054_v20, %v4202_v6  ;;  %v2379_v3 = vmul.f32 2.0, %v3509_v63 }
  0xcd   :  { %2330 = vst.msk [vmem:[%s6276_s1 + $0x1ce] sm:$0x1] %vm38_vm0, %v2036_v31  ;;  %2339 = vst.msk [vmem:[%s6276_s1 + $0x1f2] sm:$0x1] %vm38_vm0, %v2068_v33  ;;  %v2084_v36 = vcombine.high %v2068_v33, %v2068_v33  ;;  %v2484_v37 = vcombine.high %v2462_v12, %v2462_v12  ;;  %v2439_v38 = vcombine.high %v2407_v0, %v2407_v0  ;;  %v2347_v0 = vmul.f32 5.0, %v3509_v63 }
  0xce   :  { %3351 = vst.msk [vmem:[%s6276_s1 + $0x3] sm:$0x1] %vm38_vm0, %v2462_v12  ;;  %2332 = vst.msk [vmem:[%s6276_s1 + $0x1d6] sm:$0x1] %vm38_vm0, %v2033_v49  ;;  %v2037_v39 = vcombine.high %v2033_v49, %v2033_v49  ;;  %v2476_v40 = vrot.slane %v2454_v34, %v4202_v6  ;;  %v2086_v11 = vcombine.high %v2082_v35, %v2082_v35  ;;  %v2348_v17 = vmul.f32 5.0, %v3510_v8 }
  0xcf   :  { %2333 = vst.msk [vmem:[%s6276_s1 + $0x1da] sm:$0x1] %vm38_vm0, %v2035_v54  ;;  %2338 = vst.msk [vmem:[%s6276_s1 + $0x1ee] sm:$0x1] %vm38_vm0, %v2085_v22  ;;  %v2453_v48 = vrot.slane %v2439_v38, %v4202_v6  ;;  %v2360_v57 = vmul.f32 %v2344_v45, %v4885_v21  ;;  %v2361_v62 = vmul.f32 %v2345_v52, %v4917_v14 }
  0xd0   :  { %2340 = vst.msk [vmem:[%s6276_s1 + $0x1f6] sm:$0x1] %vm38_vm0, %v2082_v35  ;;  %2341 = vst.msk [vmem:[%s6276_s1 + $0x1fa] sm:$0x1] %vm38_vm0, %v2084_v36  ;;  %v2486_v55 = vcombine.high %v2476_v40, %v2476_v40  ;;  %v2362_v2 = vmul.f32 %v2346_v58, %v4985_v4  ;;  %v2363_v16 = vmul.f32 %v2347_v0, %v5021_v23  ;;  %v5652_v4 = vmul.f32 2.0, %v3510_v8 }
  0xd1   :  { %3353 = vst.msk [vmem:[%s6276_s1 + $0xb] sm:$0x1] %vm38_vm0, %v2484_v37  ;;  %2334 = vst.msk [vmem:[%s6276_s1 + $0x1de] sm:$0x1] %vm38_vm0, %v2037_v39  ;;  %v2469_v60 = vrot.slane %v2453_v48, %v4202_v6  ;;  %v2455_v61 = vcombine.high %v2453_v48, %v2453_v48  ;;  %v2392_v21 = vsub.f32 %v2360_v57, %v2376_v46 }
  0xd2   :  { %3352 = vst.msk [vmem:[%s6276_s1 + $0x7] sm:$0x1] %vm38_vm0, %v2476_v40  ;;  %2342 = vst.msk [vmem:[%s6276_s1 + $0x1fe] sm:$0x1] %vm38_vm0, %v2086_v11  ;;  %v2393_v15 = vsub.f32 %v2361_v62, %v2377_v32  ;;  %v2394_v18 = vsub.f32 %v2362_v2, %v2378_v59  ;;  %v5650_v19 = vmul.f32 %v2348_v17, %v5023_v24  ;;  %v2349_v24 = vmul.f32 5.0, %v5662_v27 }
  0xd3   :  { %3354 = vst.msk [vmem:[%s6276_s1 + $0xf] sm:$0x1] %vm38_vm0, %v2486_v55  ;;  %3355 = vst.msk [vmem:[%s6276_s1 + $0x13] sm:$0x1] %vm38_vm0, %v2469_v60  ;;  %v2483_v14 = vrot.slane %v2455_v61, %v4202_v6  ;;  %v2485_v9 = vcombine.high %v2469_v60, %v2469_v60  ;;  %v2408_v41 = vmul.f32 0.33333334, %v2392_v21  ;;  %v2395_v23 = vsub.f32 %v2363_v16, %v2379_v3 }
  0xd4   :  { %v2409_v25 = vmul.f32 0.33333334, %v2393_v15  ;;  %v2410_v30 = vmul.f32 0.33333334, %v2394_v18  ;;  %v2396_v31 = vsub.f32 %v5650_v19, %v5652_v4  ;;  %v5674_v49 = vmul.f32 %v2349_v24, %v5135_v5 }
  0xd5   :  { %3356 = vst.msk [vmem:[%s6276_s1 + $0x17] sm:$0x1] %vm38_vm0, %v2483_v14  ;;  %3357 = vst.msk [vmem:[%s6276_s1 + $0x1b] sm:$0x1] %vm38_vm0, %v2485_v9  ;;  %v2487_v13 = vcombine.high %v2483_v14, %v2483_v14  ;;  %v2495_v26 = vrot.slane %v2408_v41, %v4202_v6  ;;  %v2488_v28 = vcombine.high %v2408_v41, %v2408_v41  ;;  %v2411_v12 = vmul.f32 0.33333334, %v2395_v23 }
  0xd6   :  { %v2544_v33 = vrot.slane %v2409_v25, %v4202_v6  ;;  %v2537_v20 = vcombine.high %v2409_v25, %v2409_v25  ;;  %v2593_v35 = vrot.slane %v2410_v30, %v4202_v6  ;;  %v2586_v39 = vcombine.high %v2410_v30, %v2410_v30 }
  0xd7   :  { %3358 = vst.msk [vmem:[%s6276_s1 + $0x1f] sm:$0x1] %vm38_vm0, %v2487_v13  ;;  %v2511_v54 = vrot.slane %v2495_v26, %v4202_v6  ;;  %v2503_v22 = vcombine.high %v2495_v26, %v2495_v26  ;;  %v2502_v34 = vrot.slane %v2488_v28, %v4202_v6  ;;  %v2642_v0 = vrot.slane %v2411_v12, %v4202_v6 }
  0xd8   :  { %v2560_v36 = vrot.slane %v2544_v33, %v4202_v6  ;;  %v2552_v37 = vcombine.high %v2544_v33, %v2544_v33  ;;  %v2551_v38 = vrot.slane %v2537_v20, %v4202_v6  ;;  %v2609_v57 = vrot.slane %v2593_v35, %v4202_v6 }
  0xd9   :  { %3359 = vst.msk [vmem:[%s6276_s1 + $0x23] sm:$0x1] %vm38_vm0, %v2511_v54  ;;  %v2525_v5 = vrot.slane %v2503_v22, %v4202_v6  ;;  %v2533_v40 = vcombine.high %v2511_v54, %v2511_v54  ;;  %v2518_v44 = vrot.slane %v2502_v34, %v4202_v6  ;;  %v2504_v45 = vcombine.high %v2502_v34, %v2502_v34 }
  0xda   :  { %3367 = vst.msk [vmem:[%s6276_s1 + $0x43] sm:$0x1] %vm38_vm0, %v2560_v36  ;;  %v2574_v46 = vrot.slane %v2552_v37, %v4202_v6  ;;  %v2582_v11 = vcombine.high %v2560_v36, %v2560_v36  ;;  %v2567_v48 = vrot.slane %v2551_v38, %v4202_v6  ;;  %v2553_v50 = vcombine.high %v2551_v38, %v2551_v38  ;;  %v3512_v38 = vld [vmem:[#allocation2 + $0x38] sm:$0xff] }
  0xdb   :  { %3360 = vst.msk [vmem:[%s6276_s1 + $0x27] sm:$0x1] %vm38_vm0, %v2525_v5  ;;  %3361 = vst.msk [vmem:[%s6276_s1 + $0x2b] sm:$0x1] %vm38_vm0, %v2533_v40  ;;  %v2535_v52 = vcombine.high %v2525_v5, %v2525_v5  ;;  %v2532_v32 = vrot.slane %v2504_v45, %v4202_v6  ;;  %v2534_v55 = vcombine.high %v2518_v44, %v2518_v44  ;;  %v2412_v8 = vmul.f32 0.33333334, %v2396_v31 }
  0xdc   :  { %3363 = vst.msk [vmem:[%s6276_s1 + $0x33] sm:$0x1] %vm38_vm0, %v2518_v44  ;;  %3368 = vst.msk [vmem:[%s6276_s1 + $0x47] sm:$0x1] %vm38_vm0, %v2574_v46  ;;  %v2584_v51 = vcombine.high %v2574_v46, %v2574_v46  ;;  %v2581_v58 = vrot.slane %v2553_v50, %v4202_v6  ;;  %v2583_v59 = vcombine.high %v2567_v48, %v2567_v48  ;;  %v2382_v40 = vmul.f32 2.0, %v3512_v38  ;;  %v3513_v44 = vld [vmem:[#allocation2 + $0x40] sm:$0xff] }
  0xdd   :  { %3369 = vst.msk [vmem:[%s6276_s1 + $0x4b] sm:$0x1] %vm38_vm0, %v2582_v11  ;;  %3371 = vst.msk [vmem:[%s6276_s1 + $0x53] sm:$0x1] %vm38_vm0, %v2567_v48  ;;  %v2601_v60 = vcombine.high %v2593_v35, %v2593_v35  ;;  %v2536_v61 = vcombine.high %v2532_v32, %v2532_v32  ;;  %v2631_v62 = vcombine.high %v2609_v57, %v2609_v57  ;;  %v2351_v45 = vmul.f32 5.0, %v3513_v44 }
  0xde   :  { %3362 = vst.msk [vmem:[%s6276_s1 + $0x2f] sm:$0x1] %vm38_vm0, %v2535_v52  ;;  %3364 = vst.msk [vmem:[%s6276_s1 + $0x37] sm:$0x1] %vm38_vm0, %v2532_v32  ;;  %v2600_v63 = vrot.slane %v2586_v39, %v4202_v6  ;;  %v2585_v21 = vcombine.high %v2581_v58, %v2581_v58  ;;  %v2635_v3 = vcombine.high %v2411_v12, %v2411_v12  ;;  %v2381_v12 = vmul.f32 2.0, %v5662_v27 }
  0xdf   :  { %3365 = vst.msk [vmem:[%s6276_s1 + $0x3b] sm:$0x1] %vm38_vm0, %v2534_v55  ;;  %3375 = vst.msk [vmem:[%s6276_s1 + $0x63] sm:$0x1] %vm38_vm0, %v2609_v57  ;;  %v2623_v2 = vrot.slane %v2601_v60, %v4202_v6  ;;  %v2658_v9 = vrot.slane %v2642_v0, %v4202_v6  ;;  %v2650_v15 = vcombine.high %v2642_v0, %v2642_v0  ;;  %v2350_v39 = vmul.f32 5.0, %v3512_v38  ;;  %v3514_v55 = vld [vmem:[#allocation2 + $0x48] sm:$0xff] }
  0xe0   :  { %3370 = vst.msk [vmem:[%s6276_s1 + $0x4f] sm:$0x1] %vm38_vm0, %v2584_v51  ;;  %3372 = vst.msk [vmem:[%s6276_s1 + $0x57] sm:$0x1] %vm38_vm0, %v2581_v58  ;;  %v2616_v17 = vrot.slane %v2600_v63, %v4202_v6  ;;  %v2602_v14 = vcombine.high %v2600_v63, %v2600_v63  ;;  %v2649_v41 = vrot.slane %v2635_v3, %v4202_v6  ;;  %v2383_v32 = vmul.f32 2.0, %v3513_v44 }
  0xe1   :  { %3373 = vst.msk [vmem:[%s6276_s1 + $0x5b] sm:$0x1] %vm38_vm0, %v2583_v59  ;;  %3366 = vst.msk [vmem:[%s6276_s1 + $0x3f] sm:$0x1] %vm38_vm0, %v2536_v61  ;;  %v2633_v16 = vcombine.high %v2623_v2, %v2623_v2  ;;  %v2691_v18 = vrot.slane %v2412_v8, %v4202_v6  ;;  %v2684_v19 = vcombine.high %v2412_v8, %v2412_v8  ;;  %v2352_v57 = vmul.f32 5.0, %v3514_v55 }
  0xe2   :  { %3377 = vst.msk [vmem:[%s6276_s1 + $0x6b] sm:$0x1] %vm38_vm0, %v2631_v62  ;;  %3374 = vst.msk [vmem:[%s6276_s1 + $0x5f] sm:$0x1] %vm38_vm0, %v2585_v21  ;;  %v2630_v4 = vrot.slane %v2602_v14, %v4202_v6  ;;  %v2632_v13 = vcombine.high %v2616_v17, %v2616_v17  ;;  %v2672_v25 = vrot.slane %v2650_v15, %v4202_v6  ;;  %v2384_v51 = vmul.f32 2.0, %v3514_v55  ;;  %v3515_v62 = vld [vmem:[#allocation2 + $0x50] sm:$0xff] }
  0xe3   :  { %3376 = vst.msk [vmem:[%s6276_s1 + $0x67] sm:$0x1] %vm38_vm0, %v2623_v2  ;;  %3379 = vst.msk [vmem:[%s6276_s1 + $0x73] sm:$0x1] %vm38_vm0, %v2616_v17  ;;  %v2680_v23 = vcombine.high %v2658_v9, %v2658_v9  ;;  %v2665_v24 = vrot.slane %v2649_v41, %v4202_v6  ;;  %v2651_v26 = vcombine.high %v2649_v41, %v2649_v41  ;;  %v2353_v63 = vmul.f32 5.0, %v3515_v62 }
  0xe4   :  { %3383 = vst.msk [vmem:[%s6276_s1 + $0x83] sm:$0x1] %vm38_vm0, %v2658_v9  ;;  %3378 = vst.msk [vmem:[%s6276_s1 + $0x6f] sm:$0x1] %vm38_vm0, %v2633_v16  ;;  %v2707_v28 = vrot.slane %v2691_v18, %v4202_v6  ;;  %v2699_v30 = vcombine.high %v2691_v18, %v2691_v18  ;;  %v2634_v31 = vcombine.high %v2630_v4, %v2630_v4  ;;  %v5866_v0 = vmul.f32 2.0, %v3515_v62  ;;  %v3517_v62 = vld [vmem:[#allocation2 + $0x60] sm:$0xff] }
  0xe5   :  { %3380 = vst.msk [vmem:[%s6276_s1 + $0x77] sm:$0x1] %vm38_vm0, %v2630_v4  ;;  %3381 = vst.msk [vmem:[%s6276_s1 + $0x7b] sm:$0x1] %vm38_vm0, %v2632_v13  ;;  %v2682_v33 = vcombine.high %v2672_v25, %v2672_v25  ;;  %v2698_v20 = vrot.slane %v2684_v19, %v4202_v6  ;;  %v2679_v54 = vrot.slane %v2651_v26, %v4202_v6 }
  0xe6   :  { %3384 = vst.msk [vmem:[%s6276_s1 + $0x87] sm:$0x1] %vm38_vm0, %v2672_v25  ;;  %3385 = vst.msk [vmem:[%s6276_s1 + $0x8b] sm:$0x1] %vm38_vm0, %v2680_v23  ;;  %v2681_v22 = vcombine.high %v2665_v24, %v2665_v24  ;;  %v2721_v34 = vrot.slane %v2699_v30, %v4202_v6  ;;  %v2729_v35 = vcombine.high %v2707_v28, %v2707_v28 }
  0xe7   :  { %3387 = vst.msk [vmem:[%s6276_s1 + $0x93] sm:$0x1] %vm38_vm0, %v2665_v24  ;;  %3391 = vst.msk [vmem:[%s6276_s1 + $0xa3] sm:$0x1] %vm38_vm0, %v2707_v28  ;;  %v2714_v27 = vrot.slane %v2698_v20, %v4202_v6  ;;  %v2700_v36 = vcombine.high %v2698_v20, %v2698_v20  ;;  %v2397_v37 = vsub.f32 %v5674_v49, %v2381_v12 }
  0xe8   :  { %3382 = vst.msk [vmem:[%s6276_s1 + $0x7f] sm:$0x1] %vm38_vm0, %v2634_v31  ;;  %3386 = vst.msk [vmem:[%s6276_s1 + $0x8f] sm:$0x1] %vm38_vm0, %v2682_v33  ;;  %v2683_v5 = vcombine.high %v2679_v54, %v2679_v54  ;;  %v2731_v49 = vcombine.high %v2721_v34, %v2721_v34  ;;  %v2366_v50 = vmul.f32 %v2350_v39, %v5179_v29 }
  0xe9   :  { %3388 = vst.msk [vmem:[%s6276_s1 + $0x97] sm:$0x1] %vm38_vm0, %v2679_v54  ;;  %3389 = vst.msk [vmem:[%s6276_s1 + $0x9b] sm:$0x1] %vm38_vm0, %v2681_v22  ;;  %v2728_v46 = vrot.slane %v2700_v36, %v4202_v6  ;;  %v2730_v11 = vcombine.high %v2714_v27, %v2714_v27  ;;  %v2413_v48 = vmul.f32 0.33333334, %v2397_v37  ;;  %v2367_v52 = vmul.f32 %v2351_v45, %v5195_v42 }
  0xea   :  { %3392 = vst.msk [vmem:[%s6276_s1 + $0xa7] sm:$0x1] %vm38_vm0, %v2721_v34  ;;  %3393 = vst.msk [vmem:[%s6276_s1 + $0xab] sm:$0x1] %vm38_vm0, %v2729_v35  ;;  %v2398_v60 = vsub.f32 %v2366_v50, %v2382_v40  ;;  %v2368_v61 = vmul.f32 %v2352_v57, %v5197_v43  ;;  %v5875_v9 = vmul.f32 %v2353_v63, %v5212_v47  ;;  %v5877_v43 = vld [vmem:[#allocation2 + $0x58] sm:$0xff]  ;;  %v2355_v63 = vmul.f32 5.0, %v3517_v62 }
  0xeb   :  { %3395 = vst.msk [vmem:[%s6276_s1 + $0xb3] sm:$0x1] %vm38_vm0, %v2714_v27  ;;  %3390 = vst.msk [vmem:[%s6276_s1 + $0x9f] sm:$0x1] %vm38_vm0, %v2683_v5  ;;  %v2732_v29 = vcombine.high %v2728_v46, %v2728_v46  ;;  %v2740_v58 = vrot.slane %v2413_v48, %v4202_v6  ;;  %v2733_v59 = vcombine.high %v2413_v48, %v2413_v48  ;;  %v5880_v15 = vmul.f32 5.0, %v5877_v43 }
  0xec   :  { %3394 = vst.msk [vmem:[%s6276_s1 + $0xaf] sm:$0x1] %vm38_vm0, %v2731_v49  ;;  %3396 = vst.msk [vmem:[%s6276_s1 + $0xb7] sm:$0x1] %vm38_vm0, %v2728_v46  ;;  %v2399_v42 = vsub.f32 %v2367_v52, %v2383_v32  ;;  %v2414_v8 = vmul.f32 0.33333334, %v2398_v60  ;;  %v2400_v14 = vsub.f32 %v2368_v61, %v2384_v51  ;;  %v2401_v51 = vsub.f32 %v5875_v9, %v5866_v0 }
  0xed   :  { %3397 = vst.msk [vmem:[%s6276_s1 + $0xbb] sm:$0x1] %vm38_vm0, %v2730_v11  ;;  %3398 = vst.msk [vmem:[%s6276_s1 + $0xbf] sm:$0x1] %vm38_vm0, %v2732_v29  ;;  %v2756_v21 = vrot.slane %v2740_v58, %v4202_v6  ;;  %v2748_v2 = vcombine.high %v2740_v58, %v2740_v58  ;;  %v2747_v3 = vrot.slane %v2733_v59, %v4202_v6  ;;  %v2386_v60 = vmul.f32 2.0, %v5877_v43 }
  0xee   :  { %v2415_v17 = vmul.f32 0.33333334, %v2399_v42  ;;  %v2789_v4 = vrot.slane %v2414_v8, %v4202_v6  ;;  %v2782_v47 = vcombine.high %v2414_v8, %v2414_v8  ;;  %v2416_v28 = vmul.f32 0.33333334, %v2400_v14 }
  0xef   :  { %3399 = vst.msk [vmem:[%s6276_s1 + $0xc3] sm:$0x1] %vm38_vm0, %v2756_v21  ;;  %v2770_v16 = vrot.slane %v2748_v2, %v4202_v6  ;;  %v2778_v41 = vcombine.high %v2756_v21, %v2756_v21  ;;  %v2763_v18 = vrot.slane %v2747_v3, %v4202_v6  ;;  %v2749_v19 = vcombine.high %v2747_v3, %v2747_v3  ;;  %v3518_v2 = vld [vmem:[#allocation2 + $0x68] sm:$0xff] }
  0xf0   :  { %v2838_v13 = vrot.slane %v2415_v17, %v4202_v6  ;;  %v2831_v25 = vcombine.high %v2415_v17, %v2415_v17  ;;  %v2805_v30 = vrot.slane %v2789_v4, %v4202_v6  ;;  %v2797_v31 = vcombine.high %v2789_v4, %v2789_v4 }
  0xf1   :  { %3400 = vst.msk [vmem:[%s6276_s1 + $0xc7] sm:$0x1] %vm38_vm0, %v2770_v16  ;;  %3401 = vst.msk [vmem:[%s6276_s1 + $0xcb] sm:$0x1] %vm38_vm0, %v2778_v41  ;;  %v2780_v23 = vcombine.high %v2770_v16, %v2770_v16  ;;  %v2777_v24 = vrot.slane %v2749_v19, %v4202_v6  ;;  %v2779_v26 = vcombine.high %v2763_v18, %v2763_v18  ;;  %v2417_v61 = vmul.f32 0.33333334, %v2401_v51 }
  0xf2   :  { %3403 = vst.msk [vmem:[%s6276_s1 + $0xd3] sm:$0x1] %vm38_vm0, %v2763_v18  ;;  %v2796_v33 = vrot.slane %v2782_v47, %v4202_v6  ;;  %v2854_v20 = vrot.slane %v2838_v13, %v4202_v6  ;;  %v2846_v54 = vcombine.high %v2838_v13, %v2838_v13  ;;  %v2845_v22 = vrot.slane %v2831_v25, %v4202_v6  ;;  %v6022_v18 = vld [vmem:[#allocation2 + $0x70] sm:$0xff] }
  0xf3   :  { %3402 = vst.msk [vmem:[%s6276_s1 + $0xcf] sm:$0x1] %vm38_vm0, %v2780_v23  ;;  %3404 = vst.msk [vmem:[%s6276_s1 + $0xd7] sm:$0x1] %vm38_vm0, %v2777_v24  ;;  %v2781_v12 = vcombine.high %v2777_v24, %v2777_v24  ;;  %v2887_v34 = vrot.slane %v2416_v28, %v4202_v6  ;;  %v2819_v35 = vrot.slane %v2797_v31, %v4202_v6  ;;  %v2387_v0 = vmul.f32 2.0, %v3517_v62 }
  0xf4   :  { %3405 = vst.msk [vmem:[%s6276_s1 + $0xdb] sm:$0x1] %vm38_vm0, %v2779_v26  ;;  %3407 = vst.msk [vmem:[%s6276_s1 + $0xe3] sm:$0x1] %vm38_vm0, %v2805_v30  ;;  %v2827_v27 = vcombine.high %v2805_v30, %v2805_v30  ;;  %v2812_v36 = vrot.slane %v2796_v33, %v4202_v6  ;;  %v2798_v37 = vcombine.high %v2796_v33, %v2796_v33  ;;  %v2356_v3 = vmul.f32 5.0, %v3518_v2 }
  0xf5   :  { %3415 = vst.msk [vmem:[%s6276_s1 + $0x103] sm:$0x1] %vm38_vm0, %v2854_v20  ;;  %3406 = vst.msk [vmem:[%s6276_s1 + $0xdf] sm:$0x1] %vm38_vm0, %v2781_v12  ;;  %v2868_v38 = vrot.slane %v2846_v54, %v4202_v6  ;;  %v2876_v39 = vcombine.high %v2854_v20, %v2854_v20  ;;  %v2861_v5 = vrot.slane %v2845_v22, %v4202_v6  ;;  %v2388_v8 = vmul.f32 2.0, %v3518_v2 }
  0xf6   :  { %v2847_v49 = vcombine.high %v2845_v22, %v2845_v22  ;;  %3408 = vst.msk [vmem:[%s6276_s1 + $0xe7] sm:$0x1] %vm38_vm0, %v2819_v35  ;;  %3409 = vst.msk [vmem:[%s6276_s1 + $0xeb] sm:$0x1] %vm38_vm0, %v2827_v27  ;;  %v2829_v40 = vcombine.high %v2819_v35, %v2819_v35  ;;  %v2826_v44 = vrot.slane %v2798_v37, %v4202_v6  ;;  %v6025_v19 = vmul.f32 5.0, %v6022_v18 }
  0xf7   :  { %3411 = vst.msk [vmem:[%s6276_s1 + $0xf3] sm:$0x1] %vm38_vm0, %v2812_v36  ;;  %v2828_v45 = vcombine.high %v2812_v36, %v2812_v36  ;;  %v2903_v46 = vrot.slane %v2887_v34, %v4202_v6  ;;  %3416 = vst.msk [vmem:[%s6276_s1 + $0x107] sm:$0x1] %vm38_vm0, %v2868_v38  ;;  %v2878_v11 = vcombine.high %v2868_v38, %v2868_v38 }
  0xf8   :  { %3417 = vst.msk [vmem:[%s6276_s1 + $0x10b] sm:$0x1] %vm38_vm0, %v2876_v39  ;;  %3419 = vst.msk [vmem:[%s6276_s1 + $0x113] sm:$0x1] %vm38_vm0, %v2861_v5  ;;  %v2875_v48 = vrot.slane %v2847_v49, %v4202_v6  ;;  %v2877_v50 = vcombine.high %v2861_v5, %v2861_v5  ;;  %v2895_v52 = vcombine.high %v2887_v34, %v2887_v34 }
  0xf9   :  { %3410 = vst.msk [vmem:[%s6276_s1 + $0xef] sm:$0x1] %vm38_vm0, %v2829_v40  ;;  %3412 = vst.msk [vmem:[%s6276_s1 + $0xf7] sm:$0x1] %vm38_vm0, %v2826_v44  ;;  %v2830_v32 = vcombine.high %v2826_v44, %v2826_v44  ;;  %v2925_v55 = vcombine.high %v2903_v46, %v2903_v46  ;;  %v2880_v57 = vcombine.high %v2416_v28, %v2416_v28 }
  0xfa   :  { %3413 = vst.msk [vmem:[%s6276_s1 + $0xfb] sm:$0x1] %vm38_vm0, %v2828_v45  ;;  %3423 = vst.msk [vmem:[%s6276_s1 + $0x123] sm:$0x1] %vm38_vm0, %v2903_v46  ;;  %v2879_v29 = vcombine.high %v2875_v48, %v2875_v48  ;;  %v2917_v58 = vrot.slane %v2895_v52, %v4202_v6  ;;  %v2370_v59 = vmul.f32 %v5880_v15, %v5386_v1 }
  0xfb   :  { %3418 = vst.msk [vmem:[%s6276_s1 + $0x10f] sm:$0x1] %vm38_vm0, %v2878_v11  ;;  %3420 = vst.msk [vmem:[%s6276_s1 + $0x117] sm:$0x1] %vm38_vm0, %v2875_v48  ;;  %v2894_v42 = vrot.slane %v2880_v57, %v4202_v6  ;;  %v2936_v9 = vrot.slane %v2417_v61, %v4202_v6  ;;  %v2929_v43 = vcombine.high %v2417_v61, %v2417_v61 }
  0xfc   :  { %3421 = vst.msk [vmem:[%s6276_s1 + $0x11b] sm:$0x1] %vm38_vm0, %v2877_v50  ;;  %3414 = vst.msk [vmem:[%s6276_s1 + $0xff] sm:$0x1] %vm38_vm0, %v2830_v32  ;;  %v2927_v1 = vcombine.high %v2917_v58, %v2917_v58  ;;  %v2402_v21 = vsub.f32 %v2370_v59, %v2386_v60  ;;  %v2371_v16 = vmul.f32 %v2355_v63, %v5397_v7 }
  0xfd   :  { %3425 = vst.msk [vmem:[%s6276_s1 + $0x12b] sm:$0x1] %vm38_vm0, %v2925_v55  ;;  %3422 = vst.msk [vmem:[%s6276_s1 + $0x11f] sm:$0x1] %vm38_vm0, %v2879_v29  ;;  %v2910_v17 = vrot.slane %v2894_v42, %v4202_v6  ;;  %v2896_v14 = vcombine.high %v2894_v42, %v2894_v42  ;;  %v2372_v41 = vmul.f32 %v2356_v3, %v5406_v10  ;;  %v2389_v3 = vmul.f32 2.0, %v6022_v18 }
  0xfe   :  { %3424 = vst.msk [vmem:[%s6276_s1 + $0x127] sm:$0x1] %vm38_vm0, %v2917_v58  ;;  %3426 = vst.msk [vmem:[%s6276_s1 + $0x12f] sm:$0x1] %vm38_vm0, %v2927_v1  ;;  %v2418_v15 = vmul.f32 0.33333334, %v2402_v21  ;;  %v2952_v13 = vrot.slane %v2936_v9, %v4202_v6  ;;  %v2944_v25 = vcombine.high %v2936_v9, %v2936_v9  ;;  %v2943_v7 = vrot.slane %v2929_v43, %v4202_v6 }
  0xff   :  { %3427 = vst.msk [vmem:[%s6276_s1 + $0x133] sm:$0x1] %vm38_vm0, %v2910_v17  ;;  %v2924_v4 = vrot.slane %v2896_v14, %v4202_v6  ;;  %v2926_v47 = vcombine.high %v2910_v17, %v2910_v17  ;;  %v2403_v24 = vsub.f32 %v2371_v16, %v2387_v0  ;;  %v2404_v31 = vsub.f32 %v2372_v41, %v2388_v8  ;;  %v3520_v9 = vld [vmem:[#allocation2 + $0x78] sm:$0xff] }
 0x100   :  { %v2985_v10 = vrot.slane %v2418_v15, %v4202_v6  ;;  %v2978_v23 = vcombine.high %v2418_v15, %v2418_v15  ;;  %3431 = vst.msk [vmem:[%s6276_s1 + $0x143] sm:$0x1] %vm38_vm0, %v2952_v13  ;;  %v2966_v28 = vrot.slane %v2944_v25, %v4202_v6  ;;  %v2974_v30 = vcombine.high %v2952_v13, %v2952_v13 }
 0x101   :  { %3428 = vst.msk [vmem:[%s6276_s1 + $0x137] sm:$0x1] %vm38_vm0, %v2924_v4  ;;  %3429 = vst.msk [vmem:[%s6276_s1 + $0x13b] sm:$0x1] %vm38_vm0, %v2926_v47  ;;  %v2928_v26 = vcombine.high %v2924_v4, %v2924_v4  ;;  %v2959_v33 = vrot.slane %v2943_v7, %v4202_v6  ;;  %v2945_v20 = vcombine.high %v2943_v7, %v2943_v7  ;;  %v2419_v35 = vmul.f32 0.33333334, %v2403_v24 }
 0x102   :  { %v3001_v12 = vrot.slane %v2985_v10, %v4202_v6  ;;  %v2993_v54 = vcombine.high %v2985_v10, %v2985_v10  ;;  %3432 = vst.msk [vmem:[%s6276_s1 + $0x147] sm:$0x1] %vm38_vm0, %v2966_v28  ;;  %3433 = vst.msk [vmem:[%s6276_s1 + $0x14b] sm:$0x1] %vm38_vm0, %v2974_v30  ;;  %v2976_v22 = vcombine.high %v2966_v28, %v2966_v28  ;;  %v2420_v27 = vmul.f32 0.33333334, %v2404_v31 }
 0x103   :  { %3430 = vst.msk [vmem:[%s6276_s1 + $0x13f] sm:$0x1] %vm38_vm0, %v2928_v26  ;;  %v2992_v34 = vrot.slane %v2978_v23, %v4202_v6  ;;  %3435 = vst.msk [vmem:[%s6276_s1 + $0x153] sm:$0x1] %vm38_vm0, %v2959_v33  ;;  %v2973_v36 = vrot.slane %v2945_v20, %v4202_v6  ;;  %v2975_v37 = vcombine.high %v2959_v33, %v2959_v33  ;;  %v2358_v43 = vmul.f32 5.0, %v3520_v9 }
 0x104   :  { %3439 = vst.msk [vmem:[%s6276_s1 + $0x163] sm:$0x1] %vm38_vm0, %v3001_v12  ;;  %v3015_v38 = vrot.slane %v2993_v54, %v4202_v6  ;;  %v3023_v39 = vcombine.high %v3001_v12, %v3001_v12  ;;  %3434 = vst.msk [vmem:[%s6276_s1 + $0x14f] sm:$0x1] %vm38_vm0, %v2976_v22  ;;  %v3034_v40 = vrot.slane %v2419_v35, %v4202_v6  ;;  %v2390_v18 = vmul.f32 2.0, %v3520_v9 }
 0x105   :  { %v3008_v5 = vrot.slane %v2992_v34, %v4202_v6  ;;  %v2994_v49 = vcombine.high %v2992_v34, %v2992_v34  ;;  %v3027_v44 = vcombine.high %v2419_v35, %v2419_v35  ;;  %3436 = vst.msk [vmem:[%s6276_s1 + $0x157] sm:$0x1] %vm38_vm0, %v2973_v36  ;;  %3437 = vst.msk [vmem:[%s6276_s1 + $0x15b] sm:$0x1] %vm38_vm0, %v2975_v37 }
 0x106   :  { %v2977_v45 = vcombine.high %v2973_v36, %v2973_v36  ;;  %3440 = vst.msk [vmem:[%s6276_s1 + $0x167] sm:$0x1] %vm38_vm0, %v3015_v38  ;;  %3441 = vst.msk [vmem:[%s6276_s1 + $0x16b] sm:$0x1] %vm38_vm0, %v3023_v39  ;;  %v3025_v46 = vcombine.high %v3015_v38, %v3015_v38  ;;  %v3083_v11 = vrot.slane %v2420_v27, %v4202_v6 }
 0x107   :  { %v3076_v48 = vcombine.high %v2420_v27, %v2420_v27  ;;  %3443 = vst.msk [vmem:[%s6276_s1 + $0x173] sm:$0x1] %vm38_vm0, %v3008_v5  ;;  %v3022_v50 = vrot.slane %v2994_v49, %v4202_v6  ;;  %v3024_v52 = vcombine.high %v3008_v5, %v3008_v5  ;;  %v3050_v32 = vrot.slane %v3034_v40, %v4202_v6 }
 0x108   :  { %v3042_v55 = vcombine.high %v3034_v40, %v3034_v40  ;;  %3438 = vst.msk [vmem:[%s6276_s1 + $0x15f] sm:$0x1] %vm38_vm0, %v2977_v45  ;;  %3442 = vst.msk [vmem:[%s6276_s1 + $0x16f] sm:$0x1] %vm38_vm0, %v3025_v46  ;;  %v3041_v57 = vrot.slane %v3027_v44, %v4202_v6  ;;  %v3099_v51 = vrot.slane %v3083_v11, %v4202_v6 }
 0x109   :  { %v3091_v29 = vcombine.high %v3083_v11, %v3083_v11  ;;  %v3090_v58 = vrot.slane %v3076_v48, %v4202_v6  ;;  %3444 = vst.msk [vmem:[%s6276_s1 + $0x177] sm:$0x1] %vm38_vm0, %v3022_v50  ;;  %3445 = vst.msk [vmem:[%s6276_s1 + $0x17b] sm:$0x1] %vm38_vm0, %v3024_v52  ;;  %v3026_v59 = vcombine.high %v3022_v50, %v3022_v50 }
 0x10a   :  { %3447 = vst.msk [vmem:[%s6276_s1 + $0x183] sm:$0x1] %vm38_vm0, %v3050_v32  ;;  %v3064_v60 = vrot.slane %v3042_v55, %v4202_v6  ;;  %v3072_v42 = vcombine.high %v3050_v32, %v3050_v32  ;;  %v2373_v61 = vmul.f32 %v6025_v19, %v5481_v53  ;;  %v3057_v62 = vrot.slane %v3041_v57, %v4202_v6 }
 0x10b   :  { %v3043_v63 = vcombine.high %v3041_v57, %v3041_v57  ;;  %3455 = vst.msk [vmem:[%s6276_s1 + $0x1a3] sm:$0x1] %vm38_vm0, %v3099_v51  ;;  %v3113_v0 = vrot.slane %v3091_v29, %v4202_v6  ;;  %v3121_v1 = vcombine.high %v3099_v51, %v3099_v51  ;;  %3446 = vst.msk [vmem:[%s6276_s1 + $0x17f] sm:$0x1] %vm38_vm0, %v3026_v59 }
 0x10c   :  { %3448 = vst.msk [vmem:[%s6276_s1 + $0x187] sm:$0x1] %vm38_vm0, %v3064_v60  ;;  %3449 = vst.msk [vmem:[%s6276_s1 + $0x18b] sm:$0x1] %vm38_vm0, %v3072_v42  ;;  %v3074_v53 = vcombine.high %v3064_v60, %v3064_v60  ;;  %v3106_v21 = vrot.slane %v3090_v58, %v4202_v6  ;;  %v3092_v2 = vcombine.high %v3090_v58, %v3090_v58 }
 0x10d   :  { %3451 = vst.msk [vmem:[%s6276_s1 + $0x193] sm:$0x1] %vm38_vm0, %v3057_v62  ;;  %v3071_v8 = vrot.slane %v3043_v63, %v4202_v6  ;;  %v3073_v17 = vcombine.high %v3057_v62, %v3057_v62  ;;  %3456 = vst.msk [vmem:[%s6276_s1 + $0x1a7] sm:$0x1] %vm38_vm0, %v3113_v0  ;;  %v3123_v14 = vcombine.high %v3113_v0, %v3113_v0 }
 0x10e   :  { %3457 = vst.msk [vmem:[%s6276_s1 + $0x1ab] sm:$0x1] %vm38_vm0, %v3121_v1  ;;  %3450 = vst.msk [vmem:[%s6276_s1 + $0x18f] sm:$0x1] %vm38_vm0, %v3074_v53  ;;  %v3120_v15 = vrot.slane %v3092_v2, %v4202_v6  ;;  %v3122_v16 = vcombine.high %v3106_v21, %v3106_v21  ;;  %v2405_v41 = vsub.f32 %v2373_v61, %v2389_v3 }
 0x10f   :  { %3459 = vst.msk [vmem:[%s6276_s1 + $0x1b3] sm:$0x1] %vm38_vm0, %v3106_v21  ;;  %3452 = vst.msk [vmem:[%s6276_s1 + $0x197] sm:$0x1] %vm38_vm0, %v3071_v8  ;;  %v3075_v19 = vcombine.high %v3071_v8, %v3071_v8  ;;  %v2374_v4 = vmul.f32 %v2358_v43, %v5496_v56 }
 0x110   :  { %3453 = vst.msk [vmem:[%s6276_s1 + $0x19b] sm:$0x1] %vm38_vm0, %v3073_v17  ;;  %3458 = vst.msk [vmem:[%s6276_s1 + $0x1af] sm:$0x1] %vm38_vm0, %v3123_v14  ;;  %v3124_v47 = vcombine.high %v3120_v15, %v3120_v15  ;;  %v2421_v13 = vmul.f32 0.33333334, %v2405_v41 }
 0x111   :  { %3460 = vst.msk [vmem:[%s6276_s1 + $0x1b7] sm:$0x1] %vm38_vm0, %v3120_v15  ;;  %3461 = vst.msk [vmem:[%s6276_s1 + $0x1bb] sm:$0x1] %vm38_vm0, %v3122_v16  ;;  %v2406_v25 = vsub.f32 %v2374_v4, %v2390_v18 }
 0x112   :  { %3454 = vst.msk [vmem:[%s6276_s1 + $0x19f] sm:$0x1] %vm38_vm0, %v3075_v19  ;;  %3462 = vst.msk [vmem:[%s6276_s1 + $0x1bf] sm:$0x1] %vm38_vm0, %v3124_v47  ;;  %v3132_v56 = vrot.slane %v2421_v13, %v4202_v6  ;;  %v3125_v7 = vcombine.high %v2421_v13, %v2421_v13 }
 0x113   :  { %v2422_v10 = vmul.f32 0.33333334, %v2406_v25 }
 0x114   :  { %v3148_v23 = vrot.slane %v3132_v56, %v4202_v6  ;;  %v3140_v24 = vcombine.high %v3132_v56, %v3132_v56  ;;  %v3139_v26 = vrot.slane %v3125_v7, %v4202_v6 }
 0x115   :  { %v3181_v28 = vrot.slane %v2422_v10, %v4202_v6  ;;  %v3174_v30 = vcombine.high %v2422_v10, %v2422_v10 }
 0x116   :  { %3463 = vst.msk [vmem:[%s6276_s1 + $0x1c3] sm:$0x1] %vm38_vm0, %v3148_v23  ;;  %v3162_v31 = vrot.slane %v3140_v24, %v4202_v6  ;;  %v3170_v33 = vcombine.high %v3148_v23, %v3148_v23  ;;  %v3155_v20 = vrot.slane %v3139_v26, %v4202_v6  ;;  %v3141_v12 = vcombine.high %v3139_v26, %v3139_v26 }
 0x117   :  { %v3197_v54 = vrot.slane %v3181_v28, %v4202_v6  ;;  %v3189_v22 = vcombine.high %v3181_v28, %v3181_v28  ;;  %v3188_v34 = vrot.slane %v3174_v30, %v4202_v6 }
 0x118   :  { %3464 = vst.msk [vmem:[%s6276_s1 + $0x1c7] sm:$0x1] %vm38_vm0, %v3162_v31  ;;  %3465 = vst.msk [vmem:[%s6276_s1 + $0x1cb] sm:$0x1] %vm38_vm0, %v3170_v33  ;;  %v3172_v35 = vcombine.high %v3162_v31, %v3162_v31  ;;  %v3169_v27 = vrot.slane %v3141_v12, %v4202_v6  ;;  %v3171_v36 = vcombine.high %v3155_v20, %v3155_v20 }
 0x119   :  { %3467 = vst.msk [vmem:[%s6276_s1 + $0x1d3] sm:$0x1] %vm38_vm0, %v3155_v20  ;;  %3471 = vst.msk [vmem:[%s6276_s1 + $0x1e3] sm:$0x1] %vm38_vm0, %v3197_v54  ;;  %v3211_v37 = vrot.slane %v3189_v22, %v4202_v6  ;;  %v3219_v38 = vcombine.high %v3197_v54, %v3197_v54  ;;  %v3204_v39 = vrot.slane %v3188_v34, %v4202_v6 }
 0x11a   :  { %v3190_v5 = vcombine.high %v3188_v34, %v3188_v34  ;;  %3466 = vst.msk [vmem:[%s6276_s1 + $0x1cf] sm:$0x1] %vm38_vm0, %v3172_v35  ;;  %3468 = vst.msk [vmem:[%s6276_s1 + $0x1d7] sm:$0x1] %vm38_vm0, %v3169_v27  ;;  %v3173_v49 = vcombine.high %v3169_v27, %v3169_v27 }
 0x11b   :  { %3469 = vst.msk [vmem:[%s6276_s1 + $0x1db] sm:$0x1] %vm38_vm0, %v3171_v36  ;;  %3472 = vst.msk [vmem:[%s6276_s1 + $0x1e7] sm:$0x1] %vm38_vm0, %v3211_v37  ;;  %v3221_v40 = vcombine.high %v3211_v37, %v3211_v37  ;;  %v3220_v45 = vcombine.high %v3204_v39, %v3204_v39 }
 0x11c   :  { %3473 = vst.msk [vmem:[%s6276_s1 + $0x1eb] sm:$0x1] %vm38_vm0, %v3219_v38  ;;  %3475 = vst.msk [vmem:[%s6276_s1 + $0x1f3] sm:$0x1] %vm38_vm0, %v3204_v39  ;;  %v3218_v44 = vrot.slane %v3190_v5, %v4202_v6 }
 0x11d   :  { %3470 = vst.msk [vmem:[%s6276_s1 + $0x1df] sm:$0x1] %vm38_vm0, %v3173_v49  ;;  %3474 = vst.msk [vmem:[%s6276_s1 + $0x1ef] sm:$0x1] %vm38_vm0, %v3221_v40 }
 0x11e   :  { %3476 = vst.msk [vmem:[%s6276_s1 + $0x1f7] sm:$0x1] %vm38_vm0, %v3218_v44  ;;  %3477 = vst.msk [vmem:[%s6276_s1 + $0x1fb] sm:$0x1] %vm38_vm0, %v3220_v45  ;;  %v3222_v6 = vcombine.high %v3218_v44, %v3218_v44 }
 0x120   :  { %3478 = vst.msk [vmem:[%s6276_s1 + $0x1ff] sm:$0x1] %vm38_vm0, %v3222_v6 }
 0x121   :  { %3483 = vsyncpa [#allocation3], 1 }

</bundles_post_ra>
